<compile_context>
chip_gen: v7x
topology: tpu7x:2x2x1
jax: 0.10.0
libtpu: 0.0.40
codegen_flags: <defaults>
</compile_context>

<pallas_src>
import jax
import jax.numpy as jnp
from jax.experimental import pallas as pl
from jax.experimental.pallas import tpu as pltpu

# ----------------------------- model config (small, synthetic) -----------------------------
B, S, H = 2, 8, 32          # batch, sequence, hidden
NUM_HEADS = 4
D_HEAD = H // NUM_HEADS
INTER = 4 * H               # BERT intermediate size
NUM_LAYERS = 2
VOCAB = 40                  # stands in for len(tokenizer) after resize_token_embeddings
MAX_POS = 16
TYPE_VOCAB = 2
LN_EPS = 1e-12


# ----------------------------- in-kernel helpers -----------------------------
def _layer_norm(x, gamma, beta):
    mean = jnp.mean(x, axis=-1, keepdims=True)
    var = jnp.mean(jnp.square(x - mean), axis=-1, keepdims=True)
    inv = jax.lax.rsqrt(var + LN_EPS)
    return (x - mean) * inv * gamma + beta


def _gelu(x):
    # TODO(synk): HuggingFace BERT uses the exact erf-based GELU; tanh approximation used here
    # (maps onto the TPU EUP tanh unit) so outputs differ slightly from the PyTorch reference.
    c = 0.7978845608028654  # sqrt(2/pi)
    return 0.5 * x * (1.0 + jnp.tanh(c * (x + 0.044715 * x * x * x)))


# ----------------------------- fused encoder kernel -----------------------------
def fused_encoder_kernel(x_ref, mask_ref, embg_ref, embb_ref,
                         wqkv_ref, bqkv_ref, wo_ref, bo_ref,
                         ln1g_ref, ln1b_ref, wi_ref, bi_ref,
                         wf_ref, bf_ref, ln2g_ref, ln2b_ref,
                         o_ref):
    mask = mask_ref[0]                                           # (1, S) additive key mask
    # Embedding LayerNorm fused into the same kernel (saves a separate pallas_call).
    x = _layer_norm(x_ref[0], embg_ref[...], embb_ref[...])      # (S, H) f32

    for l in range(NUM_LAYERS):                                  # statically unrolled layers
        # ---- fused QKV projection: one (S,H)@(H,3H) bf16 MXU push; 1/sqrt(d) pre-folded into Q.
        qkv = jnp.dot(x.astype(jnp.bfloat16), wqkv_ref[l],
                      preferred_element_type=jnp.float32) + bqkv_ref[l]      # (S, 3H) f32

        # ---- heads onto a leading batch axis (static lane slices; values stay in registers)
        qs = jnp.stack([qkv[:, h * D_HEAD:(h + 1) * D_HEAD]
                        for h in range(NUM_HEADS)], axis=0)                  # (NH, S, Dh)
        ks = jnp.stack([qkv[:, H + h * D_HEAD: H + (h + 1) * D_HEAD]
                        for h in range(NUM_HEADS)], axis=0)
        vs = jnp.stack([qkv[:, 2 * H + h * D_HEAD: 2 * H + (h + 1) * D_HEAD]
                        for h in range(NUM_HEADS)], axis=0)

        # ---- batched attention across heads (no per-head scratch round-trip)
        scores = jnp.einsum("hqd,hkd->hqk",
                            qs.astype(jnp.bfloat16), ks.astype(jnp.bfloat16),
                            preferred_element_type=jnp.float32)              # (NH, S, S) f32
        scores = scores + mask                                               # mask over key axis
        scores = scores - jnp.max(scores, axis=-1, keepdims=True)
        p = jnp.exp(scores)
        p = p * pl.reciprocal(jnp.sum(p, axis=-1, keepdims=True), approx=True)  # divide -> EUP

        ctx = jnp.einsum("hqk,hkd->hqd",
                         p.astype(jnp.bfloat16), vs.astype(jnp.bfloat16),
                         preferred_element_type=jnp.float32)                 # (NH, S, Dh)
        ctx = jnp.concatenate([ctx[h] for h in range(NUM_HEADS)], axis=-1)   # (S, H)

        # ---- output projection + residual + LN1
        attn = jnp.dot(ctx.astype(jnp.bfloat16), wo_ref[l],
                       preferred_element_type=jnp.float32) + bo_ref[l]
        h1 = _layer_norm(x + attn, ln1g_ref[l], ln1b_ref[l])

        # ---- FFN (GELU) + residual + LN2
        inter = _gelu(jnp.dot(h1.astype(jnp.bfloat16), wi_ref[l],
                              preferred_element_type=jnp.float32) + bi_ref[l])
        ffn = jnp.dot(inter.astype(jnp.bfloat16), wf_ref[l],
                      preferred_element_type=jnp.float32) + bf_ref[l]
        x = _layer_norm(h1 + ffn, ln2g_ref[l], ln2b_ref[l])

    o_ref[0] = x


# ----------------------------- pallas_call wrapper -----------------------------
def _resident(shape):
    """Full-array block, same block index for every grid step (stays VMEM-resident)."""
    nd = len(shape)
    return pl.BlockSpec(shape, lambda b, _nd=nd: (0,) * _nd)


def pallas_cqa_encoder(emb, mask_add, params):
    stk = params["stacked"]
    in_specs = [
        pl.BlockSpec((1, S, H), lambda b: (b, 0, 0)),          # embedding sum (per-batch block)
        pl.BlockSpec((1, 1, S), lambda b: (b, 0, 0)),          # additive attention mask
        _resident((1, H)), _resident((1, H)),                  # embedding LN gamma/beta
        _resident((NUM_LAYERS, H, 3 * H)), _resident((NUM_LAYERS, 1, 3 * H)),   # wqkv, bqkv
        _resident((NUM_LAYERS, H, H)),     _resident((NUM_LAYERS, 1, H)),       # wo, bo
        _resident((NUM_LAYERS, 1, H)),     _resident((NUM_LAYERS, 1, H)),       # ln1 g/b
        _resident((NUM_LAYERS, H, INTER)), _resident((NUM_LAYERS, 1, INTER)),   # wi, bi
        _resident((NUM_LAYERS, INTER, H)), _resident((NUM_LAYERS, 1, H)),       # wf, bf
        _resident((NUM_LAYERS, 1, H)),     _resident((NUM_LAYERS, 1, H)),       # ln2 g/b
    ]
    return pl.pallas_call(
        fused_encoder_kernel,
        out_shape=jax.ShapeDtypeStruct((B, S, H), jnp.float32),
        grid=(B,),
        in_specs=in_specs,
        out_specs=pl.BlockSpec((1, S, H), lambda b: (b, 0, 0)),
        compiler_params=pltpu.CompilerParams(
            # parallel batch axis -> sharded across v7x's 2 TensorCores; no-op on v5e/v6e.
            dimension_semantics=("parallel",),
        ),
    )(emb, mask_add, params["emb_ln_g"], params["emb_ln_b"],
      stk["wqkv"], stk["bqkv"], stk["wo"], stk["bo"],
      stk["ln1_g"], stk["ln1_b"], stk["wi"], stk["bi"],
      stk["wf"], stk["bf"], stk["ln2_g"], stk["ln2_b"])


# ----------------------------- parameter init (deterministic, synthetic) -----------------------------
def init_params(key):
    keys = iter(jax.random.split(key, 128))

    def w(shape, scale=0.02):
        return (scale * jax.random.normal(next(keys), shape)).astype(jnp.float32)

    attn_scale = 1.0 / (D_HEAD ** 0.5)

    wqkv, bqkv, wo, bo = [], [], [], []
    ln1g, ln1b, wi, bi, wf, bf, ln2g, ln2b = [], [], [], [], [], [], [], []
    for _ in range(NUM_LAYERS):
        wq, wk, wv = w((H, H)), w((H, H)), w((H, H))
        bq = jnp.zeros((1, H), jnp.float32)
        bk = jnp.zeros((1, H), jnp.float32)
        bv = jnp.zeros((1, H), jnp.float32)
        # fold 1/sqrt(d_head) into the Q projection (weight AND bias) at init time
        wqkv.append(jnp.concatenate([wq * attn_scale, wk, wv], axis=1))      # (H, 3H)
        bqkv.append(jnp.concatenate([bq * attn_scale, bk, bv], axis=1))      # (1, 3H)
        wo.append(w((H, H)));      bo.append(jnp.zeros((1, H), jnp.float32))
        ln1g.append(jnp.ones((1, H), jnp.float32)); ln1b.append(jnp.zeros((1, H), jnp.float32))
        wi.append(w((H, INTER)));  bi.append(jnp.zeros((1, INTER), jnp.float32))
        wf.append(w((INTER, H)));  bf.append(jnp.zeros((1, H), jnp.float32))
        ln2g.append(jnp.ones((1, H), jnp.float32)); ln2b.append(jnp.zeros((1, H), jnp.float32))

    stacked = {
        # matmul weights stored bf16 (MXU-native, halves VMEM/DMA bytes); biases & LN params f32.
        "wqkv": jnp.stack(wqkv).astype(jnp.bfloat16),
        "bqkv": jnp.stack(bqkv),
        "wo": jnp.stack(wo).astype(jnp.bfloat16),
        "bo": jnp.stack(bo),
        "ln1_g": jnp.stack(ln1g), "ln1_b": jnp.stack(ln1b),
        "wi": jnp.stack(wi).astype(jnp.bfloat16),
        "bi": jnp.stack(bi),
        "wf": jnp.stack(wf).astype(jnp.bfloat16),
        "bf": jnp.stack(bf),
        "ln2_g": jnp.stack(ln2g), "ln2_b": jnp.stack(ln2b),
    }
    return {
        "word_emb": w((VOCAB, H)),
        "pos_emb": w((MAX_POS, H)),
        "type_emb": w((TYPE_VOCAB, H)),
        "emb_ln_g": jnp.ones((1, H), jnp.float32),
        "emb_ln_b": jnp.zeros((1, H), jnp.float32),
        "stacked": stacked,
    }


# ----------------------------- CQA forward -----------------------------
def cqa_forward(params, input_ids, segment_ids, attention_mask, history_ids, p_mask):
    # TODO(synk): history_ids / p_mask are unused by the reference forward's shown body
    # (it only computes BertEncoder(...).last_hidden_state); accepted for signature parity.
    del history_ids, p_mask

    # Embedding gathers stay in plain JAX glue; everything after is one fused Pallas kernel.
    emb = (jnp.take(params["word_emb"], input_ids, axis=0)
           + params["pos_emb"][None, :S, :]
           + jnp.take(params["type_emb"], segment_ids, axis=0)).astype(jnp.float32)

    # BERT-style additive attention mask: 0 where attended, -10000 where masked.
    mask_add = ((1.0 - attention_mask.astype(jnp.float32)) * -10000.0)[:, None, :]  # (B,1,S)

    return pallas_cqa_encoder(emb, mask_add, params)  # last_hidden_state, (B, S, H)


cqa_forward_jit = jax.jit(cqa_forward)


# ----------------------------- main -----------------------------
if __name__ == "__main__":
    key = jax.random.PRNGKey(0)
    pkey, ikey = jax.random.split(key)

    params = init_params(pkey)

    input_ids = jax.random.randint(ikey, (B, S), 0, VOCAB, dtype=jnp.int32)
    segment_ids = jnp.concatenate(
        [jnp.zeros((B, S // 2), jnp.int32), jnp.ones((B, S // 2), jnp.int32)], axis=1)
    attention_mask = jnp.ones((B, S), jnp.int32).at[1, S - 1].set(0)
    history_ids = jnp.zeros((B, S), jnp.int32)   # unused by forward (see TODO above)
    p_mask = jnp.zeros((B, S), jnp.int32)        # unused by forward (see TODO above)

    out = cqa_forward_jit(params, input_ids, segment_ids, attention_mask, history_ids, p_mask)
    out = jax.block_until_ready(out)

    assert out.shape == (B, S, H) and out.dtype == jnp.float32
    print("KERNEL_OK")
</pallas_src>

<mosaic_0001>
module attributes {stable_mosaic.version = 11 : i64} {
  func.func @fused_encoder_kernel(%arg0: i32, %arg1: memref<1x8x32xf32, #tpu.memory_space<vmem>>, %arg2: memref<1x1x8xf32, #tpu.memory_space<vmem>>, %arg3: memref<1x32xf32, #tpu.memory_space<vmem>>, %arg4: memref<1x32xf32, #tpu.memory_space<vmem>>, %arg5: memref<2x32x96xbf16, #tpu.memory_space<vmem>>, %arg6: memref<2x1x96xf32, #tpu.memory_space<vmem>>, %arg7: memref<2x32x32xbf16, #tpu.memory_space<vmem>>, %arg8: memref<2x1x32xf32, #tpu.memory_space<vmem>>, %arg9: memref<2x1x32xf32, #tpu.memory_space<vmem>>, %arg10: memref<2x1x32xf32, #tpu.memory_space<vmem>>, %arg11: memref<2x32x128xbf16, #tpu.memory_space<vmem>>, %arg12: memref<2x1x128xf32, #tpu.memory_space<vmem>>, %arg13: memref<2x128x32xbf16, #tpu.memory_space<vmem>>, %arg14: memref<2x1x32xf32, #tpu.memory_space<vmem>>, %arg15: memref<2x1x32xf32, #tpu.memory_space<vmem>>, %arg16: memref<2x1x32xf32, #tpu.memory_space<vmem>>, %arg17: memref<1x8x32xf32, #tpu.memory_space<vmem>>) attributes {dimension_semantics = [#tpu.dimension_semantics<parallel>], iteration_bounds = array<i64: 2>, scalar_prefetch = 0 : i64, scratch_operands = 0 : i64, tpu.core_type = #tpu.core_type<tc>, window_params = [{transform_indices = @transform_0, window_bounds = array<i64: 1, 8, 32>}, {transform_indices = @transform_1, window_bounds = array<i64: 1, 1, 8>}, {pipeline_mode = #tpu.pipeline_mode<synchronous>, transform_indices = @transform_2, window_bounds = array<i64: 1, 32>}, {pipeline_mode = #tpu.pipeline_mode<synchronous>, transform_indices = @transform_3, window_bounds = array<i64: 1, 32>}, {pipeline_mode = #tpu.pipeline_mode<synchronous>, transform_indices = @transform_4, window_bounds = array<i64: 2, 32, 96>}, {pipeline_mode = #tpu.pipeline_mode<synchronous>, transform_indices = @transform_5, window_bounds = array<i64: 2, 1, 96>}, {pipeline_mode = #tpu.pipeline_mode<synchronous>, transform_indices = @transform_6, window_bounds = array<i64: 2, 32, 32>}, {pipeline_mode = #tpu.pipeline_mode<synchronous>, transform_indices = @transform_7, window_bounds = array<i64: 2, 1, 32>}, {pipeline_mode = #tpu.pipeline_mode<synchronous>, transform_indices = @transform_8, window_bounds = array<i64: 2, 1, 32>}, {pipeline_mode = #tpu.pipeline_mode<synchronous>, transform_indices = @transform_9, window_bounds = array<i64: 2, 1, 32>}, {pipeline_mode = #tpu.pipeline_mode<synchronous>, transform_indices = @transform_10, window_bounds = array<i64: 2, 32, 128>}, {pipeline_mode = #tpu.pipeline_mode<synchronous>, transform_indices = @transform_11, window_bounds = array<i64: 2, 1, 128>}, {pipeline_mode = #tpu.pipeline_mode<synchronous>, transform_indices = @transform_12, window_bounds = array<i64: 2, 128, 32>}, {pipeline_mode = #tpu.pipeline_mode<synchronous>, transform_indices = @transform_13, window_bounds = array<i64: 2, 1, 32>}, {pipeline_mode = #tpu.pipeline_mode<synchronous>, transform_indices = @transform_14, window_bounds = array<i64: 2, 1, 32>}, {pipeline_mode = #tpu.pipeline_mode<synchronous>, transform_indices = @transform_15, window_bounds = array<i64: 2, 1, 32>}, {transform_indices = @transform_16, window_bounds = array<i64: 1, 8, 32>}]} {
    %c0 = arith.constant 0 : index
    %c0_0 = arith.constant 0 : index
    %c0_1 = arith.constant 0 : index
    %0 = vector.load %arg2[%c0, %c0_0, %c0_1] : memref<1x1x8xf32, #tpu.memory_space<vmem>>, vector<1x1x8xf32>
    %1 = vector.shape_cast %0 : vector<1x1x8xf32> to vector<1x8xf32>
    %c0_2 = arith.constant 0 : index
    %c0_3 = arith.constant 0 : index
    %c0_4 = arith.constant 0 : index
    %2 = vector.load %arg1[%c0_2, %c0_3, %c0_4] : memref<1x8x32xf32, #tpu.memory_space<vmem>>, vector<1x8x32xf32>
    %3 = vector.shape_cast %2 : vector<1x8x32xf32> to vector<8x32xf32>
    %c0_5 = arith.constant 0 : index
    %c0_6 = arith.constant 0 : index
    %4 = vector.load %arg3[%c0_5, %c0_6] : memref<1x32xf32, #tpu.memory_space<vmem>>, vector<1x32xf32>
    %c0_7 = arith.constant 0 : index
    %c0_8 = arith.constant 0 : index
    %5 = vector.load %arg4[%c0_7, %c0_8] : memref<1x32xf32, #tpu.memory_space<vmem>>, vector<1x32xf32>
    %cst = arith.constant dense<0.000000e+00> : vector<8xf32>
    %6 = vector.multi_reduction <add>, %3, %cst [1] : vector<8x32xf32> to vector<8xf32>
    %7 = vector.shape_cast %6 : vector<8xf32> to vector<8x1xf32>
    %cst_9 = arith.constant 3.200000e+01 : f32
    %8 = vector.broadcast %cst_9 : f32 to vector<8x1xf32>
    %9 = arith.divf %7, %8 : vector<8x1xf32>
    %10 = vector.broadcast %9 : vector<8x1xf32> to vector<8x32xf32>
    %11 = arith.subf %3, %10 : vector<8x32xf32>
    %12 = arith.mulf %11, %11 : vector<8x32xf32>
    %cst_10 = arith.constant dense<0.000000e+00> : vector<8xf32>
    %13 = vector.multi_reduction <add>, %12, %cst_10 [1] : vector<8x32xf32> to vector<8xf32>
    %14 = vector.shape_cast %13 : vector<8xf32> to vector<8x1xf32>
    %cst_11 = arith.constant 3.200000e+01 : f32
    %15 = vector.broadcast %cst_11 : f32 to vector<8x1xf32>
    %16 = arith.divf %14, %15 : vector<8x1xf32>
    %cst_12 = arith.constant 9.99999996E-13 : f32
    %17 = vector.broadcast %cst_12 : f32 to vector<8x1xf32>
    %18 = arith.addf %16, %17 : vector<8x1xf32>
    %19 = math.rsqrt %18 : vector<8x1xf32>
    %20 = vector.broadcast %9 : vector<8x1xf32> to vector<8x32xf32>
    %21 = arith.subf %3, %20 : vector<8x32xf32>
    %22 = vector.broadcast %19 : vector<8x1xf32> to vector<8x32xf32>
    %23 = arith.mulf %21, %22 : vector<8x32xf32>
    %24 = vector.broadcast %4 : vector<1x32xf32> to vector<8x32xf32>
    %25 = arith.mulf %23, %24 : vector<8x32xf32>
    %26 = vector.broadcast %5 : vector<1x32xf32> to vector<8x32xf32>
    %27 = arith.addf %25, %26 : vector<8x32xf32>
    %28 = arith.truncf %27 : vector<8x32xf32> to vector<8x32xbf16>
    %c0_13 = arith.constant 0 : index
    %c0_14 = arith.constant 0 : index
    %c0_15 = arith.constant 0 : index
    %29 = vector.load %arg5[%c0_13, %c0_14, %c0_15] : memref<2x32x96xbf16, #tpu.memory_space<vmem>>, vector<1x32x96xbf16>
    %30 = vector.shape_cast %29 : vector<1x32x96xbf16> to vector<32x96xbf16>
    %cst_16 = arith.constant dense<0.000000e+00> : vector<8x96xf32>
    %31 = tpu.matmul %28, %30, %cst_16 {dimension_numbers = #tpu.dot_dimension_numbers<[1], [0], [0], [1], [0, 0, 1, 1], [], []>} : vector<8x32xbf16>, vector<32x96xbf16>, vector<8x96xf32> -> vector<8x96xf32>
    %c0_17 = arith.constant 0 : index
    %c0_18 = arith.constant 0 : index
    %c0_19 = arith.constant 0 : index
    %32 = vector.load %arg6[%c0_17, %c0_18, %c0_19] : memref<2x1x96xf32, #tpu.memory_space<vmem>>, vector<1x1x96xf32>
    %33 = vector.shape_cast %32 : vector<1x1x96xf32> to vector<1x96xf32>
    %34 = vector.broadcast %33 : vector<1x96xf32> to vector<8x96xf32>
    %35 = arith.addf %31, %34 : vector<8x96xf32>
    %36 = vector.extract_strided_slice %35 {offsets = [0, 0], sizes = [8, 8], strides = [1, 1]} : vector<8x96xf32> to vector<8x8xf32>
    %37 = vector.extract_strided_slice %35 {offsets = [0, 8], sizes = [8, 8], strides = [1, 1]} : vector<8x96xf32> to vector<8x8xf32>
    %38 = vector.extract_strided_slice %35 {offsets = [0, 16], sizes = [8, 8], strides = [1, 1]} : vector<8x96xf32> to vector<8x8xf32>
    %39 = vector.extract_strided_slice %35 {offsets = [0, 24], sizes = [8, 8], strides = [1, 1]} : vector<8x96xf32> to vector<8x8xf32>
    %40 = vector.shape_cast %36 : vector<8x8xf32> to vector<1x8x8xf32>
    %41 = vector.shape_cast %37 : vector<8x8xf32> to vector<1x8x8xf32>
    %42 = vector.shape_cast %38 : vector<8x8xf32> to vector<1x8x8xf32>
    %43 = vector.shape_cast %39 : vector<8x8xf32> to vector<1x8x8xf32>
    %44 = tpu.concatenate %40, %41, %42, %43 in 0 : vector<1x8x8xf32>, vector<1x8x8xf32>, vector<1x8x8xf32>, vector<1x8x8xf32> -> vector<4x8x8xf32>
    %45 = vector.extract_strided_slice %35 {offsets = [0, 32], sizes = [8, 8], strides = [1, 1]} : vector<8x96xf32> to vector<8x8xf32>
    %46 = vector.extract_strided_slice %35 {offsets = [0, 40], sizes = [8, 8], strides = [1, 1]} : vector<8x96xf32> to vector<8x8xf32>
    %47 = vector.extract_strided_slice %35 {offsets = [0, 48], sizes = [8, 8], strides = [1, 1]} : vector<8x96xf32> to vector<8x8xf32>
    %48 = vector.extract_strided_slice %35 {offsets = [0, 56], sizes = [8, 8], strides = [1, 1]} : vector<8x96xf32> to vector<8x8xf32>
    %49 = vector.shape_cast %45 : vector<8x8xf32> to vector<1x8x8xf32>
    %50 = vector.shape_cast %46 : vector<8x8xf32> to vector<1x8x8xf32>
    %51 = vector.shape_cast %47 : vector<8x8xf32> to vector<1x8x8xf32>
    %52 = vector.shape_cast %48 : vector<8x8xf32> to vector<1x8x8xf32>
    %53 = tpu.concatenate %49, %50, %51, %52 in 0 : vector<1x8x8xf32>, vector<1x8x8xf32>, vector<1x8x8xf32>, vector<1x8x8xf32> -> vector<4x8x8xf32>
    %54 = vector.extract_strided_slice %35 {offsets = [0, 64], sizes = [8, 8], strides = [1, 1]} : vector<8x96xf32> to vector<8x8xf32>
    %55 = vector.extract_strided_slice %35 {offsets = [0, 72], sizes = [8, 8], strides = [1, 1]} : vector<8x96xf32> to vector<8x8xf32>
    %56 = vector.extract_strided_slice %35 {offsets = [0, 80], sizes = [8, 8], strides = [1, 1]} : vector<8x96xf32> to vector<8x8xf32>
    %57 = vector.extract_strided_slice %35 {offsets = [0, 88], sizes = [8, 8], strides = [1, 1]} : vector<8x96xf32> to vector<8x8xf32>
    %58 = vector.shape_cast %54 : vector<8x8xf32> to vector<1x8x8xf32>
    %59 = vector.shape_cast %55 : vector<8x8xf32> to vector<1x8x8xf32>
    %60 = vector.shape_cast %56 : vector<8x8xf32> to vector<1x8x8xf32>
    %61 = vector.shape_cast %57 : vector<8x8xf32> to vector<1x8x8xf32>
    %62 = tpu.concatenate %58, %59, %60, %61 in 0 : vector<1x8x8xf32>, vector<1x8x8xf32>, vector<1x8x8xf32>, vector<1x8x8xf32> -> vector<4x8x8xf32>
    %63 = arith.truncf %44 : vector<4x8x8xf32> to vector<4x8x8xbf16>
    %64 = arith.truncf %53 : vector<4x8x8xf32> to vector<4x8x8xbf16>
    "tpu.trace_start"() <{level = 10 : i32, message = "hqd,hkd->hqk"}> : () -> ()
    %cst_20 = arith.constant dense<0.000000e+00> : vector<4x8x8xf32>
    %65 = tpu.matmul %63, %64, %cst_20 {dimension_numbers = #tpu.dot_dimension_numbers<[2], [2], [1], [1], [0, 0, 0, 1, 1, 1], [0], [0]>} : vector<4x8x8xbf16>, vector<4x8x8xbf16>, vector<4x8x8xf32> -> vector<4x8x8xf32>
    "tpu.trace_stop"() : () -> ()
    %66 = vector.shape_cast %1 : vector<1x8xf32> to vector<1x1x8xf32>
    %67 = vector.broadcast %66 : vector<1x1x8xf32> to vector<4x8x8xf32>
    %68 = arith.addf %65, %67 : vector<4x8x8xf32>
    %cst_21 = arith.constant dense<0xFF800000> : vector<4x8xf32>
    %69 = vector.multi_reduction <maximumf>, %68, %cst_21 [2] : vector<4x8x8xf32> to vector<4x8xf32>
    %70 = vector.shape_cast %69 : vector<4x8xf32> to vector<4x8x1xf32>
    %71 = vector.broadcast %70 : vector<4x8x1xf32> to vector<4x8x8xf32>
    %72 = arith.subf %68, %71 : vector<4x8x8xf32>
    %73 = math.exp %72 : vector<4x8x8xf32>
    %cst_22 = arith.constant dense<0.000000e+00> : vector<4x8xf32>
    %74 = vector.multi_reduction <add>, %73, %cst_22 [2] : vector<4x8x8xf32> to vector<4x8xf32>
    %75 = vector.shape_cast %74 : vector<4x8xf32> to vector<4x8x1xf32>
    %76 = tpu.reciprocal %75 {approx = true} : vector<4x8x1xf32> -> vector<4x8x1xf32>
    %77 = vector.broadcast %76 : vector<4x8x1xf32> to vector<4x8x8xf32>
    %78 = arith.mulf %73, %77 : vector<4x8x8xf32>
    %79 = arith.truncf %78 : vector<4x8x8xf32> to vector<4x8x8xbf16>
    %80 = arith.truncf %62 : vector<4x8x8xf32> to vector<4x8x8xbf16>
    "tpu.trace_start"() <{level = 10 : i32, message = "hqk,hkd->hqd"}> : () -> ()
    %cst_23 = arith.constant dense<0.000000e+00> : vector<4x8x8xf32>
    %81 = tpu.matmul %79, %80, %cst_23 {dimension_numbers = #tpu.dot_dimension_numbers<[2], [1], [1], [2], [0, 0, 0, 1, 1, 2], [0], [0]>} : vector<4x8x8xbf16>, vector<4x8x8xbf16>, vector<4x8x8xf32> -> vector<4x8x8xf32>
    "tpu.trace_stop"() : () -> ()
    %82 = vector.extract_strided_slice %81 {offsets = [0, 0, 0], sizes = [1, 8, 8], strides = [1, 1, 1]} : vector<4x8x8xf32> to vector<1x8x8xf32>
    %83 = vector.shape_cast %82 : vector<1x8x8xf32> to vector<8x8xf32>
    %84 = vector.extract_strided_slice %81 {offsets = [1, 0, 0], sizes = [1, 8, 8], strides = [1, 1, 1]} : vector<4x8x8xf32> to vector<1x8x8xf32>
    %85 = vector.shape_cast %84 : vector<1x8x8xf32> to vector<8x8xf32>
    %86 = vector.extract_strided_slice %81 {offsets = [2, 0, 0], sizes = [1, 8, 8], strides = [1, 1, 1]} : vector<4x8x8xf32> to vector<1x8x8xf32>
    %87 = vector.shape_cast %86 : vector<1x8x8xf32> to vector<8x8xf32>
    %88 = vector.extract_strided_slice %81 {offsets = [3, 0, 0], sizes = [1, 8, 8], strides = [1, 1, 1]} : vector<4x8x8xf32> to vector<1x8x8xf32>
    %89 = vector.shape_cast %88 : vector<1x8x8xf32> to vector<8x8xf32>
    %90 = tpu.concatenate %83, %85, %87, %89 in 1 : vector<8x8xf32>, vector<8x8xf32>, vector<8x8xf32>, vector<8x8xf32> -> vector<8x32xf32>
    %91 = arith.truncf %90 : vector<8x32xf32> to vector<8x32xbf16>
    %c0_24 = arith.constant 0 : index
    %c0_25 = arith.constant 0 : index
    %c0_26 = arith.constant 0 : index
    %92 = vector.load %arg7[%c0_24, %c0_25, %c0_26] : memref<2x32x32xbf16, #tpu.memory_space<vmem>>, vector<1x32x32xbf16>
    %93 = vector.shape_cast %92 : vector<1x32x32xbf16> to vector<32x32xbf16>
    %cst_27 = arith.constant dense<0.000000e+00> : vector<8x32xf32>
    %94 = tpu.matmul %91, %93, %cst_27 {dimension_numbers = #tpu.dot_dimension_numbers<[1], [0], [0], [1], [0, 0, 1, 1], [], []>} : vector<8x32xbf16>, vector<32x32xbf16>, vector<8x32xf32> -> vector<8x32xf32>
    %c0_28 = arith.constant 0 : index
    %c0_29 = arith.constant 0 : index
    %c0_30 = arith.constant 0 : index
    %95 = vector.load %arg8[%c0_28, %c0_29, %c0_30] : memref<2x1x32xf32, #tpu.memory_space<vmem>>, vector<1x1x32xf32>
    %96 = vector.shape_cast %95 : vector<1x1x32xf32> to vector<1x32xf32>
    %97 = vector.broadcast %96 : vector<1x32xf32> to vector<8x32xf32>
    %98 = arith.addf %94, %97 : vector<8x32xf32>
    %99 = arith.addf %27, %98 : vector<8x32xf32>
    %c0_31 = arith.constant 0 : index
    %c0_32 = arith.constant 0 : index
    %c0_33 = arith.constant 0 : index
    %100 = vector.load %arg9[%c0_31, %c0_32, %c0_33] : memref<2x1x32xf32, #tpu.memory_space<vmem>>, vector<1x1x32xf32>
    %101 = vector.shape_cast %100 : vector<1x1x32xf32> to vector<1x32xf32>
    %c0_34 = arith.constant 0 : index
    %c0_35 = arith.constant 0 : index
    %c0_36 = arith.constant 0 : index
    %102 = vector.load %arg10[%c0_34, %c0_35, %c0_36] : memref<2x1x32xf32, #tpu.memory_space<vmem>>, vector<1x1x32xf32>
    %103 = vector.shape_cast %102 : vector<1x1x32xf32> to vector<1x32xf32>
    %cst_37 = arith.constant dense<0.000000e+00> : vector<8xf32>
    %104 = vector.multi_reduction <add>, %99, %cst_37 [1] : vector<8x32xf32> to vector<8xf32>
    %105 = vector.shape_cast %104 : vector<8xf32> to vector<8x1xf32>
    %cst_38 = arith.constant 3.200000e+01 : f32
    %106 = vector.broadcast %cst_38 : f32 to vector<8x1xf32>
    %107 = arith.divf %105, %106 : vector<8x1xf32>
    %108 = vector.broadcast %107 : vector<8x1xf32> to vector<8x32xf32>
    %109 = arith.subf %99, %108 : vector<8x32xf32>
    %110 = arith.mulf %109, %109 : vector<8x32xf32>
    %cst_39 = arith.constant dense<0.000000e+00> : vector<8xf32>
    %111 = vector.multi_reduction <add>, %110, %cst_39 [1] : vector<8x32xf32> to vector<8xf32>
    %112 = vector.shape_cast %111 : vector<8xf32> to vector<8x1xf32>
    %cst_40 = arith.constant 3.200000e+01 : f32
    %113 = vector.broadcast %cst_40 : f32 to vector<8x1xf32>
    %114 = arith.divf %112, %113 : vector<8x1xf32>
    %cst_41 = arith.constant 9.99999996E-13 : f32
    %115 = vector.broadcast %cst_41 : f32 to vector<8x1xf32>
    %116 = arith.addf %114, %115 : vector<8x1xf32>
    %117 = math.rsqrt %116 : vector<8x1xf32>
    %118 = vector.broadcast %107 : vector<8x1xf32> to vector<8x32xf32>
    %119 = arith.subf %99, %118 : vector<8x32xf32>
    %120 = vector.broadcast %117 : vector<8x1xf32> to vector<8x32xf32>
    %121 = arith.mulf %119, %120 : vector<8x32xf32>
    %122 = vector.broadcast %101 : vector<1x32xf32> to vector<8x32xf32>
    %123 = arith.mulf %121, %122 : vector<8x32xf32>
    %124 = vector.broadcast %103 : vector<1x32xf32> to vector<8x32xf32>
    %125 = arith.addf %123, %124 : vector<8x32xf32>
    %126 = arith.truncf %125 : vector<8x32xf32> to vector<8x32xbf16>
    %c0_42 = arith.constant 0 : index
    %c0_43 = arith.constant 0 : index
    %c0_44 = arith.constant 0 : index
    %127 = vector.load %arg11[%c0_42, %c0_43, %c0_44] : memref<2x32x128xbf16, #tpu.memory_space<vmem>>, vector<1x32x128xbf16>
    %128 = vector.shape_cast %127 : vector<1x32x128xbf16> to vector<32x128xbf16>
    %cst_45 = arith.constant dense<0.000000e+00> : vector<8x128xf32>
    %129 = tpu.matmul %126, %128, %cst_45 {dimension_numbers = #tpu.dot_dimension_numbers<[1], [0], [0], [1], [0, 0, 1, 1], [], []>} : vector<8x32xbf16>, vector<32x128xbf16>, vector<8x128xf32> -> vector<8x128xf32>
    %c0_46 = arith.constant 0 : index
    %c0_47 = arith.constant 0 : index
    %c0_48 = arith.constant 0 : index
    %130 = vector.load %arg12[%c0_46, %c0_47, %c0_48] : memref<2x1x128xf32, #tpu.memory_space<vmem>>, vector<1x1x128xf32>
    %131 = vector.shape_cast %130 : vector<1x1x128xf32> to vector<1x128xf32>
    %132 = vector.broadcast %131 : vector<1x128xf32> to vector<8x128xf32>
    %133 = arith.addf %129, %132 : vector<8x128xf32>
    %cst_49 = arith.constant 5.000000e-01 : f32
    %134 = vector.broadcast %cst_49 : f32 to vector<8x128xf32>
    %135 = arith.mulf %134, %133 : vector<8x128xf32>
    %cst_50 = arith.constant 4.471500e-02 : f32
    %136 = vector.broadcast %cst_50 : f32 to vector<8x128xf32>
    %137 = arith.mulf %136, %133 : vector<8x128xf32>
    %138 = arith.mulf %137, %133 : vector<8x128xf32>
    %139 = arith.mulf %138, %133 : vector<8x128xf32>
    %140 = arith.addf %133, %139 : vector<8x128xf32>
    %cst_51 = arith.constant 0.797884583 : f32
    %141 = vector.broadcast %cst_51 : f32 to vector<8x128xf32>
    %142 = arith.mulf %141, %140 : vector<8x128xf32>
    %143 = math.tanh %142 : vector<8x128xf32>
    %cst_52 = arith.constant 1.000000e+00 : f32
    %144 = vector.broadcast %cst_52 : f32 to vector<8x128xf32>
    %145 = arith.addf %144, %143 : vector<8x128xf32>
    %146 = arith.mulf %135, %145 : vector<8x128xf32>
    %147 = arith.truncf %146 : vector<8x128xf32> to vector<8x128xbf16>
    %c0_53 = arith.constant 0 : index
    %c0_54 = arith.constant 0 : index
    %c0_55 = arith.constant 0 : index
    %148 = vector.load %arg13[%c0_53, %c0_54, %c0_55] : memref<2x128x32xbf16, #tpu.memory_space<vmem>>, vector<1x128x32xbf16>
    %149 = vector.shape_cast %148 : vector<1x128x32xbf16> to vector<128x32xbf16>
    %cst_56 = arith.constant dense<0.000000e+00> : vector<8x32xf32>
    %150 = tpu.matmul %147, %149, %cst_56 {dimension_numbers = #tpu.dot_dimension_numbers<[1], [0], [0], [1], [0, 0, 1, 1], [], []>} : vector<8x128xbf16>, vector<128x32xbf16>, vector<8x32xf32> -> vector<8x32xf32>
    %c0_57 = arith.constant 0 : index
    %c0_58 = arith.constant 0 : index
    %c0_59 = arith.constant 0 : index
    %151 = vector.load %arg14[%c0_57, %c0_58, %c0_59] : memref<2x1x32xf32, #tpu.memory_space<vmem>>, vector<1x1x32xf32>
    %152 = vector.shape_cast %151 : vector<1x1x32xf32> to vector<1x32xf32>
    %153 = vector.broadcast %152 : vector<1x32xf32> to vector<8x32xf32>
    %154 = arith.addf %150, %153 : vector<8x32xf32>
    %155 = arith.addf %125, %154 : vector<8x32xf32>
    %c0_60 = arith.constant 0 : index
    %c0_61 = arith.constant 0 : index
    %c0_62 = arith.constant 0 : index
    %156 = vector.load %arg15[%c0_60, %c0_61, %c0_62] : memref<2x1x32xf32, #tpu.memory_space<vmem>>, vector<1x1x32xf32>
    %157 = vector.shape_cast %156 : vector<1x1x32xf32> to vector<1x32xf32>
    %c0_63 = arith.constant 0 : index
    %c0_64 = arith.constant 0 : index
    %c0_65 = arith.constant 0 : index
    %158 = vector.load %arg16[%c0_63, %c0_64, %c0_65] : memref<2x1x32xf32, #tpu.memory_space<vmem>>, vector<1x1x32xf32>
    %159 = vector.shape_cast %158 : vector<1x1x32xf32> to vector<1x32xf32>
    %cst_66 = arith.constant dense<0.000000e+00> : vector<8xf32>
    %160 = vector.multi_reduction <add>, %155, %cst_66 [1] : vector<8x32xf32> to vector<8xf32>
    %161 = vector.shape_cast %160 : vector<8xf32> to vector<8x1xf32>
    %cst_67 = arith.constant 3.200000e+01 : f32
    %162 = vector.broadcast %cst_67 : f32 to vector<8x1xf32>
    %163 = arith.divf %161, %162 : vector<8x1xf32>
    %164 = vector.broadcast %163 : vector<8x1xf32> to vector<8x32xf32>
    %165 = arith.subf %155, %164 : vector<8x32xf32>
    %166 = arith.mulf %165, %165 : vector<8x32xf32>
    %cst_68 = arith.constant dense<0.000000e+00> : vector<8xf32>
    %167 = vector.multi_reduction <add>, %166, %cst_68 [1] : vector<8x32xf32> to vector<8xf32>
    %168 = vector.shape_cast %167 : vector<8xf32> to vector<8x1xf32>
    %cst_69 = arith.constant 3.200000e+01 : f32
    %169 = vector.broadcast %cst_69 : f32 to vector<8x1xf32>
    %170 = arith.divf %168, %169 : vector<8x1xf32>
    %cst_70 = arith.constant 9.99999996E-13 : f32
    %171 = vector.broadcast %cst_70 : f32 to vector<8x1xf32>
    %172 = arith.addf %170, %171 : vector<8x1xf32>
    %173 = math.rsqrt %172 : vector<8x1xf32>
    %174 = vector.broadcast %163 : vector<8x1xf32> to vector<8x32xf32>
    %175 = arith.subf %155, %174 : vector<8x32xf32>
    %176 = vector.broadcast %173 : vector<8x1xf32> to vector<8x32xf32>
    %177 = arith.mulf %175, %176 : vector<8x32xf32>
    %178 = vector.broadcast %157 : vector<1x32xf32> to vector<8x32xf32>
    %179 = arith.mulf %177, %178 : vector<8x32xf32>
    %180 = vector.broadcast %159 : vector<1x32xf32> to vector<8x32xf32>
    %181 = arith.addf %179, %180 : vector<8x32xf32>
    %182 = arith.truncf %181 : vector<8x32xf32> to vector<8x32xbf16>
    %c1 = arith.constant 1 : index
    %c0_71 = arith.constant 0 : index
    %c0_72 = arith.constant 0 : index
    %183 = vector.load %arg5[%c1, %c0_71, %c0_72] : memref<2x32x96xbf16, #tpu.memory_space<vmem>>, vector<1x32x96xbf16>
    %184 = vector.shape_cast %183 : vector<1x32x96xbf16> to vector<32x96xbf16>
    %cst_73 = arith.constant dense<0.000000e+00> : vector<8x96xf32>
    %185 = tpu.matmul %182, %184, %cst_73 {dimension_numbers = #tpu.dot_dimension_numbers<[1], [0], [0], [1], [0, 0, 1, 1], [], []>} : vector<8x32xbf16>, vector<32x96xbf16>, vector<8x96xf32> -> vector<8x96xf32>
    %c1_74 = arith.constant 1 : index
    %c0_75 = arith.constant 0 : index
    %c0_76 = arith.constant 0 : index
    %186 = vector.load %arg6[%c1_74, %c0_75, %c0_76] : memref<2x1x96xf32, #tpu.memory_space<vmem>>, vector<1x1x96xf32>
    %187 = vector.shape_cast %186 : vector<1x1x96xf32> to vector<1x96xf32>
    %188 = vector.broadcast %187 : vector<1x96xf32> to vector<8x96xf32>
    %189 = arith.addf %185, %188 : vector<8x96xf32>
    %190 = vector.extract_strided_slice %189 {offsets = [0, 0], sizes = [8, 8], strides = [1, 1]} : vector<8x96xf32> to vector<8x8xf32>
    %191 = vector.extract_strided_slice %189 {offsets = [0, 8], sizes = [8, 8], strides = [1, 1]} : vector<8x96xf32> to vector<8x8xf32>
    %192 = vector.extract_strided_slice %189 {offsets = [0, 16], sizes = [8, 8], strides = [1, 1]} : vector<8x96xf32> to vector<8x8xf32>
    %193 = vector.extract_strided_slice %189 {offsets = [0, 24], sizes = [8, 8], strides = [1, 1]} : vector<8x96xf32> to vector<8x8xf32>
    %194 = vector.shape_cast %190 : vector<8x8xf32> to vector<1x8x8xf32>
    %195 = vector.shape_cast %191 : vector<8x8xf32> to vector<1x8x8xf32>
    %196 = vector.shape_cast %192 : vector<8x8xf32> to vector<1x8x8xf32>
    %197 = vector.shape_cast %193 : vector<8x8xf32> to vector<1x8x8xf32>
    %198 = tpu.concatenate %194, %195, %196, %197 in 0 : vector<1x8x8xf32>, vector<1x8x8xf32>, vector<1x8x8xf32>, vector<1x8x8xf32> -> vector<4x8x8xf32>
    %199 = vector.extract_strided_slice %189 {offsets = [0, 32], sizes = [8, 8], strides = [1, 1]} : vector<8x96xf32> to vector<8x8xf32>
    %200 = vector.extract_strided_slice %189 {offsets = [0, 40], sizes = [8, 8], strides = [1, 1]} : vector<8x96xf32> to vector<8x8xf32>
    %201 = vector.extract_strided_slice %189 {offsets = [0, 48], sizes = [8, 8], strides = [1, 1]} : vector<8x96xf32> to vector<8x8xf32>
    %202 = vector.extract_strided_slice %189 {offsets = [0, 56], sizes = [8, 8], strides = [1, 1]} : vector<8x96xf32> to vector<8x8xf32>
    %203 = vector.shape_cast %199 : vector<8x8xf32> to vector<1x8x8xf32>
    %204 = vector.shape_cast %200 : vector<8x8xf32> to vector<1x8x8xf32>
    %205 = vector.shape_cast %201 : vector<8x8xf32> to vector<1x8x8xf32>
    %206 = vector.shape_cast %202 : vector<8x8xf32> to vector<1x8x8xf32>
    %207 = tpu.concatenate %203, %204, %205, %206 in 0 : vector<1x8x8xf32>, vector<1x8x8xf32>, vector<1x8x8xf32>, vector<1x8x8xf32> -> vector<4x8x8xf32>
    %208 = vector.extract_strided_slice %189 {offsets = [0, 64], sizes = [8, 8], strides = [1, 1]} : vector<8x96xf32> to vector<8x8xf32>
    %209 = vector.extract_strided_slice %189 {offsets = [0, 72], sizes = [8, 8], strides = [1, 1]} : vector<8x96xf32> to vector<8x8xf32>
    %210 = vector.extract_strided_slice %189 {offsets = [0, 80], sizes = [8, 8], strides = [1, 1]} : vector<8x96xf32> to vector<8x8xf32>
    %211 = vector.extract_strided_slice %189 {offsets = [0, 88], sizes = [8, 8], strides = [1, 1]} : vector<8x96xf32> to vector<8x8xf32>
    %212 = vector.shape_cast %208 : vector<8x8xf32> to vector<1x8x8xf32>
    %213 = vector.shape_cast %209 : vector<8x8xf32> to vector<1x8x8xf32>
    %214 = vector.shape_cast %210 : vector<8x8xf32> to vector<1x8x8xf32>
    %215 = vector.shape_cast %211 : vector<8x8xf32> to vector<1x8x8xf32>
    %216 = tpu.concatenate %212, %213, %214, %215 in 0 : vector<1x8x8xf32>, vector<1x8x8xf32>, vector<1x8x8xf32>, vector<1x8x8xf32> -> vector<4x8x8xf32>
    %217 = arith.truncf %198 : vector<4x8x8xf32> to vector<4x8x8xbf16>
    %218 = arith.truncf %207 : vector<4x8x8xf32> to vector<4x8x8xbf16>
    "tpu.trace_start"() <{level = 10 : i32, message = "hqd,hkd->hqk"}> : () -> ()
    %cst_77 = arith.constant dense<0.000000e+00> : vector<4x8x8xf32>
    %219 = tpu.matmul %217, %218, %cst_77 {dimension_numbers = #tpu.dot_dimension_numbers<[2], [2], [1], [1], [0, 0, 0, 1, 1, 1], [0], [0]>} : vector<4x8x8xbf16>, vector<4x8x8xbf16>, vector<4x8x8xf32> -> vector<4x8x8xf32>
    "tpu.trace_stop"() : () -> ()
    %220 = vector.shape_cast %1 : vector<1x8xf32> to vector<1x1x8xf32>
    %221 = vector.broadcast %220 : vector<1x1x8xf32> to vector<4x8x8xf32>
    %222 = arith.addf %219, %221 : vector<4x8x8xf32>
    %cst_78 = arith.constant dense<0xFF800000> : vector<4x8xf32>
    %223 = vector.multi_reduction <maximumf>, %222, %cst_78 [2] : vector<4x8x8xf32> to vector<4x8xf32>
    %224 = vector.shape_cast %223 : vector<4x8xf32> to vector<4x8x1xf32>
    %225 = vector.broadcast %224 : vector<4x8x1xf32> to vector<4x8x8xf32>
    %226 = arith.subf %222, %225 : vector<4x8x8xf32>
    %227 = math.exp %226 : vector<4x8x8xf32>
    %cst_79 = arith.constant dense<0.000000e+00> : vector<4x8xf32>
    %228 = vector.multi_reduction <add>, %227, %cst_79 [2] : vector<4x8x8xf32> to vector<4x8xf32>
    %229 = vector.shape_cast %228 : vector<4x8xf32> to vector<4x8x1xf32>
    %230 = tpu.reciprocal %229 {approx = true} : vector<4x8x1xf32> -> vector<4x8x1xf32>
    %231 = vector.broadcast %230 : vector<4x8x1xf32> to vector<4x8x8xf32>
    %232 = arith.mulf %227, %231 : vector<4x8x8xf32>
    %233 = arith.truncf %232 : vector<4x8x8xf32> to vector<4x8x8xbf16>
    %234 = arith.truncf %216 : vector<4x8x8xf32> to vector<4x8x8xbf16>
    "tpu.trace_start"() <{level = 10 : i32, message = "hqk,hkd->hqd"}> : () -> ()
    %cst_80 = arith.constant dense<0.000000e+00> : vector<4x8x8xf32>
    %235 = tpu.matmul %233, %234, %cst_80 {dimension_numbers = #tpu.dot_dimension_numbers<[2], [1], [1], [2], [0, 0, 0, 1, 1, 2], [0], [0]>} : vector<4x8x8xbf16>, vector<4x8x8xbf16>, vector<4x8x8xf32> -> vector<4x8x8xf32>
    "tpu.trace_stop"() : () -> ()
    %236 = vector.extract_strided_slice %235 {offsets = [0, 0, 0], sizes = [1, 8, 8], strides = [1, 1, 1]} : vector<4x8x8xf32> to vector<1x8x8xf32>
    %237 = vector.shape_cast %236 : vector<1x8x8xf32> to vector<8x8xf32>
    %238 = vector.extract_strided_slice %235 {offsets = [1, 0, 0], sizes = [1, 8, 8], strides = [1, 1, 1]} : vector<4x8x8xf32> to vector<1x8x8xf32>
    %239 = vector.shape_cast %238 : vector<1x8x8xf32> to vector<8x8xf32>
    %240 = vector.extract_strided_slice %235 {offsets = [2, 0, 0], sizes = [1, 8, 8], strides = [1, 1, 1]} : vector<4x8x8xf32> to vector<1x8x8xf32>
    %241 = vector.shape_cast %240 : vector<1x8x8xf32> to vector<8x8xf32>
    %242 = vector.extract_strided_slice %235 {offsets = [3, 0, 0], sizes = [1, 8, 8], strides = [1, 1, 1]} : vector<4x8x8xf32> to vector<1x8x8xf32>
    %243 = vector.shape_cast %242 : vector<1x8x8xf32> to vector<8x8xf32>
    %244 = tpu.concatenate %237, %239, %241, %243 in 1 : vector<8x8xf32>, vector<8x8xf32>, vector<8x8xf32>, vector<8x8xf32> -> vector<8x32xf32>
    %245 = arith.truncf %244 : vector<8x32xf32> to vector<8x32xbf16>
    %c1_81 = arith.constant 1 : index
    %c0_82 = arith.constant 0 : index
    %c0_83 = arith.constant 0 : index
    %246 = vector.load %arg7[%c1_81, %c0_82, %c0_83] : memref<2x32x32xbf16, #tpu.memory_space<vmem>>, vector<1x32x32xbf16>
    %247 = vector.shape_cast %246 : vector<1x32x32xbf16> to vector<32x32xbf16>
    %cst_84 = arith.constant dense<0.000000e+00> : vector<8x32xf32>
    %248 = tpu.matmul %245, %247, %cst_84 {dimension_numbers = #tpu.dot_dimension_numbers<[1], [0], [0], [1], [0, 0, 1, 1], [], []>} : vector<8x32xbf16>, vector<32x32xbf16>, vector<8x32xf32> -> vector<8x32xf32>
    %c1_85 = arith.constant 1 : index
    %c0_86 = arith.constant 0 : index
    %c0_87 = arith.constant 0 : index
    %249 = vector.load %arg8[%c1_85, %c0_86, %c0_87] : memref<2x1x32xf32, #tpu.memory_space<vmem>>, vector<1x1x32xf32>
    %250 = vector.shape_cast %249 : vector<1x1x32xf32> to vector<1x32xf32>
    %251 = vector.broadcast %250 : vector<1x32xf32> to vector<8x32xf32>
    %252 = arith.addf %248, %251 : vector<8x32xf32>
    %253 = arith.addf %181, %252 : vector<8x32xf32>
    %c1_88 = arith.constant 1 : index
    %c0_89 = arith.constant 0 : index
    %c0_90 = arith.constant 0 : index
    %254 = vector.load %arg9[%c1_88, %c0_89, %c0_90] : memref<2x1x32xf32, #tpu.memory_space<vmem>>, vector<1x1x32xf32>
    %255 = vector.shape_cast %254 : vector<1x1x32xf32> to vector<1x32xf32>
    %c1_91 = arith.constant 1 : index
    %c0_92 = arith.constant 0 : index
    %c0_93 = arith.constant 0 : index
    %256 = vector.load %arg10[%c1_91, %c0_92, %c0_93] : memref<2x1x32xf32, #tpu.memory_space<vmem>>, vector<1x1x32xf32>
    %257 = vector.shape_cast %256 : vector<1x1x32xf32> to vector<1x32xf32>
    %cst_94 = arith.constant dense<0.000000e+00> : vector<8xf32>
    %258 = vector.multi_reduction <add>, %253, %cst_94 [1] : vector<8x32xf32> to vector<8xf32>
    %259 = vector.shape_cast %258 : vector<8xf32> to vector<8x1xf32>
    %cst_95 = arith.constant 3.200000e+01 : f32
    %260 = vector.broadcast %cst_95 : f32 to vector<8x1xf32>
    %261 = arith.divf %259, %260 : vector<8x1xf32>
    %262 = vector.broadcast %261 : vector<8x1xf32> to vector<8x32xf32>
    %263 = arith.subf %253, %262 : vector<8x32xf32>
    %264 = arith.mulf %263, %263 : vector<8x32xf32>
    %cst_96 = arith.constant dense<0.000000e+00> : vector<8xf32>
    %265 = vector.multi_reduction <add>, %264, %cst_96 [1] : vector<8x32xf32> to vector<8xf32>
    %266 = vector.shape_cast %265 : vector<8xf32> to vector<8x1xf32>
    %cst_97 = arith.constant 3.200000e+01 : f32
    %267 = vector.broadcast %cst_97 : f32 to vector<8x1xf32>
    %268 = arith.divf %266, %267 : vector<8x1xf32>
    %cst_98 = arith.constant 9.99999996E-13 : f32
    %269 = vector.broadcast %cst_98 : f32 to vector<8x1xf32>
    %270 = arith.addf %268, %269 : vector<8x1xf32>
    %271 = math.rsqrt %270 : vector<8x1xf32>
    %272 = vector.broadcast %261 : vector<8x1xf32> to vector<8x32xf32>
    %273 = arith.subf %253, %272 : vector<8x32xf32>
    %274 = vector.broadcast %271 : vector<8x1xf32> to vector<8x32xf32>
    %275 = arith.mulf %273, %274 : vector<8x32xf32>
    %276 = vector.broadcast %255 : vector<1x32xf32> to vector<8x32xf32>
    %277 = arith.mulf %275, %276 : vector<8x32xf32>
    %278 = vector.broadcast %257 : vector<1x32xf32> to vector<8x32xf32>
    %279 = arith.addf %277, %278 : vector<8x32xf32>
    %280 = arith.truncf %279 : vector<8x32xf32> to vector<8x32xbf16>
    %c1_99 = arith.constant 1 : index
    %c0_100 = arith.constant 0 : index
    %c0_101 = arith.constant 0 : index
    %281 = vector.load %arg11[%c1_99, %c0_100, %c0_101] : memref<2x32x128xbf16, #tpu.memory_space<vmem>>, vector<1x32x128xbf16>
    %282 = vector.shape_cast %281 : vector<1x32x128xbf16> to vector<32x128xbf16>
    %cst_102 = arith.constant dense<0.000000e+00> : vector<8x128xf32>
    %283 = tpu.matmul %280, %282, %cst_102 {dimension_numbers = #tpu.dot_dimension_numbers<[1], [0], [0], [1], [0, 0, 1, 1], [], []>} : vector<8x32xbf16>, vector<32x128xbf16>, vector<8x128xf32> -> vector<8x128xf32>
    %c1_103 = arith.constant 1 : index
    %c0_104 = arith.constant 0 : index
    %c0_105 = arith.constant 0 : index
    %284 = vector.load %arg12[%c1_103, %c0_104, %c0_105] : memref<2x1x128xf32, #tpu.memory_space<vmem>>, vector<1x1x128xf32>
    %285 = vector.shape_cast %284 : vector<1x1x128xf32> to vector<1x128xf32>
    %286 = vector.broadcast %285 : vector<1x128xf32> to vector<8x128xf32>
    %287 = arith.addf %283, %286 : vector<8x128xf32>
    %cst_106 = arith.constant 5.000000e-01 : f32
    %288 = vector.broadcast %cst_106 : f32 to vector<8x128xf32>
    %289 = arith.mulf %288, %287 : vector<8x128xf32>
    %cst_107 = arith.constant 4.471500e-02 : f32
    %290 = vector.broadcast %cst_107 : f32 to vector<8x128xf32>
    %291 = arith.mulf %290, %287 : vector<8x128xf32>
    %292 = arith.mulf %291, %287 : vector<8x128xf32>
    %293 = arith.mulf %292, %287 : vector<8x128xf32>
    %294 = arith.addf %287, %293 : vector<8x128xf32>
    %cst_108 = arith.constant 0.797884583 : f32
    %295 = vector.broadcast %cst_108 : f32 to vector<8x128xf32>
    %296 = arith.mulf %295, %294 : vector<8x128xf32>
    %297 = math.tanh %296 : vector<8x128xf32>
    %cst_109 = arith.constant 1.000000e+00 : f32
    %298 = vector.broadcast %cst_109 : f32 to vector<8x128xf32>
    %299 = arith.addf %298, %297 : vector<8x128xf32>
    %300 = arith.mulf %289, %299 : vector<8x128xf32>
    %301 = arith.truncf %300 : vector<8x128xf32> to vector<8x128xbf16>
    %c1_110 = arith.constant 1 : index
    %c0_111 = arith.constant 0 : index
    %c0_112 = arith.constant 0 : index
    %302 = vector.load %arg13[%c1_110, %c0_111, %c0_112] : memref<2x128x32xbf16, #tpu.memory_space<vmem>>, vector<1x128x32xbf16>
    %303 = vector.shape_cast %302 : vector<1x128x32xbf16> to vector<128x32xbf16>
    %cst_113 = arith.constant dense<0.000000e+00> : vector<8x32xf32>
    %304 = tpu.matmul %301, %303, %cst_113 {dimension_numbers = #tpu.dot_dimension_numbers<[1], [0], [0], [1], [0, 0, 1, 1], [], []>} : vector<8x128xbf16>, vector<128x32xbf16>, vector<8x32xf32> -> vector<8x32xf32>
    %c1_114 = arith.constant 1 : index
    %c0_115 = arith.constant 0 : index
    %c0_116 = arith.constant 0 : index
    %305 = vector.load %arg14[%c1_114, %c0_115, %c0_116] : memref<2x1x32xf32, #tpu.memory_space<vmem>>, vector<1x1x32xf32>
    %306 = vector.shape_cast %305 : vector<1x1x32xf32> to vector<1x32xf32>
    %307 = vector.broadcast %306 : vector<1x32xf32> to vector<8x32xf32>
    %308 = arith.addf %304, %307 : vector<8x32xf32>
    %309 = arith.addf %279, %308 : vector<8x32xf32>
    %c1_117 = arith.constant 1 : index
    %c0_118 = arith.constant 0 : index
    %c0_119 = arith.constant 0 : index
    %310 = vector.load %arg15[%c1_117, %c0_118, %c0_119] : memref<2x1x32xf32, #tpu.memory_space<vmem>>, vector<1x1x32xf32>
    %311 = vector.shape_cast %310 : vector<1x1x32xf32> to vector<1x32xf32>
    %c1_120 = arith.constant 1 : index
    %c0_121 = arith.constant 0 : index
    %c0_122 = arith.constant 0 : index
    %312 = vector.load %arg16[%c1_120, %c0_121, %c0_122] : memref<2x1x32xf32, #tpu.memory_space<vmem>>, vector<1x1x32xf32>
    %313 = vector.shape_cast %312 : vector<1x1x32xf32> to vector<1x32xf32>
    %cst_123 = arith.constant dense<0.000000e+00> : vector<8xf32>
    %314 = vector.multi_reduction <add>, %309, %cst_123 [1] : vector<8x32xf32> to vector<8xf32>
    %315 = vector.shape_cast %314 : vector<8xf32> to vector<8x1xf32>
    %cst_124 = arith.constant 3.200000e+01 : f32
    %316 = vector.broadcast %cst_124 : f32 to vector<8x1xf32>
    %317 = arith.divf %315, %316 : vector<8x1xf32>
    %318 = vector.broadcast %317 : vector<8x1xf32> to vector<8x32xf32>
    %319 = arith.subf %309, %318 : vector<8x32xf32>
    %320 = arith.mulf %319, %319 : vector<8x32xf32>
    %cst_125 = arith.constant dense<0.000000e+00> : vector<8xf32>
    %321 = vector.multi_reduction <add>, %320, %cst_125 [1] : vector<8x32xf32> to vector<8xf32>
    %322 = vector.shape_cast %321 : vector<8xf32> to vector<8x1xf32>
    %cst_126 = arith.constant 3.200000e+01 : f32
    %323 = vector.broadcast %cst_126 : f32 to vector<8x1xf32>
    %324 = arith.divf %322, %323 : vector<8x1xf32>
    %cst_127 = arith.constant 9.99999996E-13 : f32
    %325 = vector.broadcast %cst_127 : f32 to vector<8x1xf32>
    %326 = arith.addf %324, %325 : vector<8x1xf32>
    %327 = math.rsqrt %326 : vector<8x1xf32>
    %328 = vector.broadcast %317 : vector<8x1xf32> to vector<8x32xf32>
    %329 = arith.subf %309, %328 : vector<8x32xf32>
    %330 = vector.broadcast %327 : vector<8x1xf32> to vector<8x32xf32>
    %331 = arith.mulf %329, %330 : vector<8x32xf32>
    %332 = vector.broadcast %311 : vector<1x32xf32> to vector<8x32xf32>
    %333 = arith.mulf %331, %332 : vector<8x32xf32>
    %334 = vector.broadcast %313 : vector<1x32xf32> to vector<8x32xf32>
    %335 = arith.addf %333, %334 : vector<8x32xf32>
    %c0_128 = arith.constant 0 : index
    %c0_129 = arith.constant 0 : index
    %c0_130 = arith.constant 0 : index
    %336 = vector.load %arg17[%c0_128, %c0_129, %c0_130] : memref<1x8x32xf32, #tpu.memory_space<vmem>>, vector<1x8x32xf32>
    %337 = vector.shape_cast %336 : vector<1x8x32xf32> to vector<8x32xf32>
    %338 = vector.shape_cast %335 : vector<8x32xf32> to vector<1x8x32xf32>
    tpu.vector_store %arg17[%c0_128, %c0_129, %c0_130], %338 {strides = array<i32>} : memref<1x8x32xf32, #tpu.memory_space<vmem>>, vector<1x8x32xf32>,
    return
  }
  func.func @transform_0(%arg0: i32) -> (i32, i32, i32) {
    %c0_i32 = arith.constant 0 : i32
    %c0_i32_0 = arith.constant 0 : i32
    %c0_i32_1 = arith.constant 0 : i32
    return %arg0, %c0_i32, %c0_i32_0 : i32, i32, i32
  }
  func.func @transform_1(%arg0: i32) -> (i32, i32, i32) {
    %c0_i32 = arith.constant 0 : i32
    %c0_i32_0 = arith.constant 0 : i32
    %c0_i32_1 = arith.constant 0 : i32
    return %arg0, %c0_i32, %c0_i32_0 : i32, i32, i32
  }
  func.func @transform_2(%arg0: i32) -> (i32, i32) {
    %c0_i32 = arith.constant 0 : i32
    %c0_i32_0 = arith.constant 0 : i32
    %c0_i32_1 = arith.constant 0 : i32
    return %c0_i32, %c0_i32_0 : i32, i32
  }
  func.func @transform_3(%arg0: i32) -> (i32, i32) {
    %c0_i32 = arith.constant 0 : i32
    %c0_i32_0 = arith.constant 0 : i32
    %c0_i32_1 = arith.constant 0 : i32
    return %c0_i32, %c0_i32_0 : i32, i32
  }
  func.func @transform_4(%arg0: i32) -> (i32, i32, i32) {
    %c0_i32 = arith.constant 0 : i32
    %c0_i32_0 = arith.constant 0 : i32
    %c0_i32_1 = arith.constant 0 : i32
    %c0_i32_2 = arith.constant 0 : i32
    return %c0_i32, %c0_i32_0, %c0_i32_1 : i32, i32, i32
  }
  func.func @transform_5(%arg0: i32) -> (i32, i32, i32) {
    %c0_i32 = arith.constant 0 : i32
    %c0_i32_0 = arith.constant 0 : i32
    %c0_i32_1 = arith.constant 0 : i32
    %c0_i32_2 = arith.constant 0 : i32
    return %c0_i32, %c0_i32_0, %c0_i32_1 : i32, i32, i32
  }
  func.func @transform_6(%arg0: i32) -> (i32, i32, i32) {
    %c0_i32 = arith.constant 0 : i32
    %c0_i32_0 = arith.constant 0 : i32
    %c0_i32_1 = arith.constant 0 : i32
    %c0_i32_2 = arith.constant 0 : i32
    return %c0_i32, %c0_i32_0, %c0_i32_1 : i32, i32, i32
  }
  func.func @transform_7(%arg0: i32) -> (i32, i32, i32) {
    %c0_i32 = arith.constant 0 : i32
    %c0_i32_0 = arith.constant 0 : i32
    %c0_i32_1 = arith.constant 0 : i32
    %c0_i32_2 = arith.constant 0 : i32
    return %c0_i32, %c0_i32_0, %c0_i32_1 : i32, i32, i32
  }
  func.func @transform_8(%arg0: i32) -> (i32, i32, i32) {
    %c0_i32 = arith.constant 0 : i32
    %c0_i32_0 = arith.constant 0 : i32
    %c0_i32_1 = arith.constant 0 : i32
    %c0_i32_2 = arith.constant 0 : i32
    return %c0_i32, %c0_i32_0, %c0_i32_1 : i32, i32, i32
  }
  func.func @transform_9(%arg0: i32) -> (i32, i32, i32) {
    %c0_i32 = arith.constant 0 : i32
    %c0_i32_0 = arith.constant 0 : i32
    %c0_i32_1 = arith.constant 0 : i32
    %c0_i32_2 = arith.constant 0 : i32
    return %c0_i32, %c0_i32_0, %c0_i32_1 : i32, i32, i32
  }
  func.func @transform_10(%arg0: i32) -> (i32, i32, i32) {
    %c0_i32 = arith.constant 0 : i32
    %c0_i32_0 = arith.constant 0 : i32
    %c0_i32_1 = arith.constant 0 : i32
    %c0_i32_2 = arith.constant 0 : i32
    return %c0_i32, %c0_i32_0, %c0_i32_1 : i32, i32, i32
  }
  func.func @transform_11(%arg0: i32) -> (i32, i32, i32) {
    %c0_i32 = arith.constant 0 : i32
    %c0_i32_0 = arith.constant 0 : i32
    %c0_i32_1 = arith.constant 0 : i32
    %c0_i32_2 = arith.constant 0 : i32
    return %c0_i32, %c0_i32_0, %c0_i32_1 : i32, i32, i32
  }
  func.func @transform_12(%arg0: i32) -> (i32, i32, i32) {
    %c0_i32 = arith.constant 0 : i32
    %c0_i32_0 = arith.constant 0 : i32
    %c0_i32_1 = arith.constant 0 : i32
    %c0_i32_2 = arith.constant 0 : i32
    return %c0_i32, %c0_i32_0, %c0_i32_1 : i32, i32, i32
  }
  func.func @transform_13(%arg0: i32) -> (i32, i32, i32) {
    %c0_i32 = arith.constant 0 : i32
    %c0_i32_0 = arith.constant 0 : i32
    %c0_i32_1 = arith.constant 0 : i32
    %c0_i32_2 = arith.constant 0 : i32
    return %c0_i32, %c0_i32_0, %c0_i32_1 : i32, i32, i32
  }
  func.func @transform_14(%arg0: i32) -> (i32, i32, i32) {
    %c0_i32 = arith.constant 0 : i32
    %c0_i32_0 = arith.constant 0 : i32
    %c0_i32_1 = arith.constant 0 : i32
    %c0_i32_2 = arith.constant 0 : i32
    return %c0_i32, %c0_i32_0, %c0_i32_1 : i32, i32, i32
  }
  func.func @transform_15(%arg0: i32) -> (i32, i32, i32) {
    %c0_i32 = arith.constant 0 : i32
    %c0_i32_0 = arith.constant 0 : i32
    %c0_i32_1 = arith.constant 0 : i32
    %c0_i32_2 = arith.constant 0 : i32
    return %c0_i32, %c0_i32_0, %c0_i32_1 : i32, i32, i32
  }
  func.func @transform_16(%arg0: i32) -> (i32, i32, i32) {
    %c0_i32 = arith.constant 0 : i32
    %c0_i32_0 = arith.constant 0 : i32
    %c0_i32_1 = arith.constant 0 : i32
    return %arg0, %c0_i32, %c0_i32_0 : i32, i32, i32
  }
}

</mosaic_0001>

<bundles_post_ra>
// kernel: cqa_forward.1
= control target key start
LH: loop header
LB: loop body
LE: loop exit
PB: predicated region body
PF: predicated region fallthrough
CT: control target
= control target key end

     0   :  { %s3510_s0 = inlined_call_operand.vmem [shape: f32[2,8,32], index: 0, kind: input, shape index: {}]   ;;  %s3511_s1 = inlined_call_operand.vmem [shape: f32[2,1,8], index: 1, kind: input, shape index: {}]   ;;  %s3512_s2 = inlined_call_operand.vmem [shape: f32[1,32], index: 2, kind: input, shape index: {}]   ;;  %s3513_s3 = inlined_call_operand.vmem [shape: f32[1,32], index: 3, kind: input, shape index: {}]   ;;  %s3514_s4 = inlined_call_operand.vmem [shape: bf16[2,32,96], index: 4, kind: input, shape index: {}]   ;;  %s3515_s5 = inlined_call_operand.vmem [shape: f32[2,1,96], index: 5, kind: input, shape index: {}]   ;;  %s3516_s6 = inlined_call_operand.vmem [shape: bf16[2,32,32], index: 6, kind: input, shape index: {}]   ;;  %s3517_s7 = inlined_call_operand.vmem [shape: f32[2,1,32], index: 7, kind: input, shape index: {}]   ;;  %s3518_s8 = inlined_call_operand.vmem [shape: f32[2,1,32], index: 8, kind: input, shape index: {}]   ;;  %s3519_s9 = inlined_call_operand.vmem [shape: f32[2,1,32], index: 9, kind: input, shape index: {}]   ;;  %s3520_s10 = inlined_call_operand.vmem [shape: bf16[2,32,128], index: 10, kind: input, shape index: {}]   ;;  %s3521_s11 = inlined_call_operand.vmem [shape: f32[2,1,128], index: 11, kind: input, shape index: {}]   ;;  %s3522_s12 = inlined_call_operand.vmem [shape: bf16[2,128,32], index: 12, kind: input, shape index: {}]   ;;  %s3523_s13 = inlined_call_operand.vmem [shape: f32[2,1,32], index: 13, kind: input, shape index: {}]   ;;  %s3524_s14 = inlined_call_operand.vmem [shape: f32[2,1,32], index: 14, kind: input, shape index: {}]   ;;  %s3525_s15 = inlined_call_operand.vmem [shape: f32[2,1,32], index: 15, kind: input, shape index: {}]   ;;  %s3526_s16 = inlined_call_operand.hbm [shape: f32[2,8,32], index: 16, kind: output, shape index: {}]  }
   0x1   :  { %3538 = sst [smem:[#allocation7_spill]] %s3510_s0 }
   0x2   :  { %3539 = sst [smem:[#allocation8_spill]] %s3511_s1 }
   0x3   :  { %3540 = sst [smem:[#allocation9_spill]] %s3512_s2 }
   0x4   :  { %3541 = sst [smem:[#allocation10_spill]] %s3513_s3 }
   0x5   :  { %3542 = sst [smem:[#allocation11_spill]] %s3514_s4 }
   0x6   :  { %21 = vsyncpa [#allocation3], 0 }
   0x7   :  { %23 = vsyncpa [#allocation3 + $0x1], 0  ;;  %s3014_s21 = smov 0   ;;  %s3016_s22 = smov 0  }
   0x8   :  { %s3018_s23 = smov 0   ;;  %s3020_s24 = smov 0  }
   0x9 LB: > { %3543 = sst [smem:[#allocation5_spill]] %s2912_s23  ;;  %s3035_s25 = sadd.s32 4294967295, %s2916_s24   ;;  %s2916_s24 = sphi %s3020_s24, %s3564_s24   ;;  %s2912_s23 = sphi %s3018_s23, %s3561_s23   ;;  %s2908_s22 = sphi %s3016_s22, %s3563_s22   ;;  %s2904_s21 = sphi %s3014_s21, %s3562_s21  }
   0xa   : > { %s2364_s26 = sadd.s32 4294967294, %s2916_s24   ;;  %s3039_s27 = sadd.s32 1, %s2916_s24  }
   0xb   : > { %s382_s28 = sadd.s32 1, %s2912_s23  ;;  %s379_s29 = ssub.s32 %s2916_s24, %s3039_s27 }
   0xc   : > { %p392_p0 = scmp.ne.s32.totalorder %s2912_s23, %s2908_s22  ;;  %p380_p1 = scmp.eq.s32.totalorder %s379_s29, 0 }
   0xd   : > { %p393_p2 = scmp.eq.s32.totalorder %s3035_s25, 1  ;;  %p398_p3 = scmp.ne.s32.totalorder %s2908_s22, %s2904_s21 }
   0xe   : > { %p399_p4 = scmp.eq.s32.totalorder %s2364_s26, 1  ;;  %p2367_p7 = scmp.ge.s32.totalorder %s2916_s24, 1 }
   0xf   : > { %s3050_s30 = scalar_select %p380_p1, %s2912_s23, %s382_s28  }
  0x10   : > { %p3052_p5 = por %p393_p2, %p392_p0  ;;  %p3056_p6 = por %p399_p4, %p398_p3 }
  0x11   : > { %3544 = sst [smem:[#allocation6_spill]] %s3050_s30  ;;  %p472_p8 = scmp.lt.s32.totalorder %s2916_s24, 3 }
  0x13   : > { %p473_p9 = pnand %p2367_p7, %p472_p8 }
  0x14   : > { %p524_p10 = scmp.lt.s32.totalorder (!%p473_p9), %s3035_s25, 1  ;;  %vm536_vm0 = vcmask (!%p473_p9), 261120   ;;  %s3547_s28 = sld [smem:[#allocation7_spill]] (!%p473_p9)  ;;  %v2918_v8 = vmov (!%p473_p9), 0.0   ;;  %vm2919_vm1 = vmmov (!%p473_p9), 0   ;;  %vm655_vm2 = vcmask (!%p473_p9), 64512  }
  0x15   : > { %476 = sbr.rel (%p473_p9) target bundleno = 5617 (0x15f1), region = 84  ;;  %s3548_s4 = sld [smem:[#allocation11_spill]] (!%p473_p9)  ;;  %2547 = vmatprep.subr.bf16.mxu1 (!%p473_p9), %v2918_v8  ;;  %2573 = vmatprep.subr.bf16.mxu0 (!%p473_p9), %v2918_v8  ;;  %v2372_v20 = vld [vmem:[%s3515_s5] ss:$0 sm:$0xff] (!%p473_p9)  ;;  %vm902_vm3 = vcmask (!%p473_p9), 1043456   ;;  %vm1103_vm4 = vcmask (!%p473_p9), 130048  }
  0x16   : > { %2551 = vmatprep.mubr.msk.bf16.mxu1 (!%p473_p9), %vm2919_vm1, %v2918_v8  ;;  %2575 = vmatprep.mubr.msk.bf16.mxu0 (!%p473_p9), %vm2919_vm1, %v2918_v8  ;;  %s3549_s2 = sld [smem:[#allocation9_spill]] (!%p473_p9)  ;;  %s3550_s3 = sld [smem:[#allocation10_spill]] (!%p473_p9)  ;;  %vm1105_vm5 = vcmask (!%p473_p9), 195584  }
  0x17   : > { %s3535_s20 = smov (!%p473_p9), 104   ;;  %s3536_s23 = smov (!%p473_p9), 120  }
  0x18   : > { %s3537_s30 = smov (!%p473_p9), 112   ;;  %s3530_s26 = smov (!%p473_p9), 96  }
  0x19   : > { %s3551_s1 = sld [smem:[#allocation8_spill]] (!%p473_p9) }
  0x1b   : > { %v2780_v7 = vld [vmem:[%s3548_s4] sm:$0xff] (!%p473_p9)   ;;  %v2781_v9 = vld [vmem:[%s3548_s4 + $0x8] sm:$0xff] (!%p473_p9)  }
  0x1c   : > { %s3064_s18 = scalar_select %p524_p10, %s3035_s25, 1  ;;  %2548 = vmatpush3.bf16.msra.mxu1 %v2780_v7  ;;  %v2370_v14 = vld [vmem:[%s3549_s2] ss:$0 sm:$0xff] }
  0x1d   : > { %2549 = vmatprep.subr.bf16.mxu1 %v2918_v8  ;;  %v2371_v16 = vld [vmem:[%s3550_s3] ss:$0 sm:$0xff] }
  0x1e   : > { %s2369_s19 = sshll.u32 %s3064_s18, 3 }
  0x1f   : > { %s527_s29 = scalar_lea.vmem %s3547_s28, %s2369_s19  ;;  %s530_s19 = scalar_lea.vmem %s3551_s1, %s3064_s18 }
  0x20   : > { %v533_v0 = vld [vmem:[%s527_s29] sm:$0xff]  ;;  %2550 = vmatpush3.bf16.msra.mxu1 %v2781_v9  ;;  %s3528_s18 = smov 64   ;;  %s3533_s28 = smov 16  }
  0x21   : > { %v537_v1 = vsel %vm536_vm0, %v533_v0, 0.0  ;;  %2555 = vmatprep.subr.bf16.mxu1 %v2918_v8  ;;  %v3149_v41 = vld [vmem:[%s530_s19] ss:$0 sm:$0xff]  ;;  %s3532_s29 = smov 24   ;;  %s3555_s19 = smov 96  }
  0x22   : > { %538 = vadd.xlane.f32.xlu0 %v537_v1 }
  0xaf   : > { %v539_v2 = vpop.xlane.xlu0 %538 }
  0xb0   : > { %v541_v3 = vmul.f32 0.03125, %v539_v2 }
  0xb2   : > { %v542_v4 = vsub.f32 %v533_v0, %v541_v3 }
  0xb4   : > { %v543_v5 = vmul.f32 %v542_v4, %v542_v4 }
  0xb6   : > { %v544_v6 = vsel %vm536_vm0, %v543_v5, 0.0 }
  0xb7   : > { %545 = vadd.xlane.f32.xlu0 %v544_v6 }
 0x144   : > { %v546_v10 = vpop.xlane.xlu0 %545 }
 0x145   : > { %v547_v11 = vmul.f32 0.03125, %v546_v10 }
 0x147   : > { %v548_v12 = vadd.f32 1e-12, %v547_v11 }
 0x149   : > { %2808 = vrsqrt.f32 %v548_v12 }
 0x153   : > { %v2809_v13 = vpop.eup %2808 }
 0x154   : > { %v550_v15 = vmul.f32 %v2809_v13, %v542_v4 }
 0x156   : > { %v557_v17 = vmul.f32 %v2370_v14, %v550_v15 }
 0x158   : > { %v3092_v18 = vadd.f32 %v2371_v16, %v557_v17 }
 0x15a   : > { %v565_v19 = vpack.c.bf16 %v3092_v18, %v3092_v18 }
 0x15c   : > { %2552 = vmatmul.mubr.msk.bf16.vlgmr.msra.gmra.mrb[0].mxu1 %vm536_vm0, %v565_v19 }
 0x15d   : > { %2557 = vmatprep.mubr.msk.bf16.mxu1 %vm2919_vm1, %v2918_v8 }
 0x22f   : > { %v626_v21 = vpop.f32.mrb[0].mxu1 }
 0x230   : > { %v627_v22 = vadd.f32 %v2372_v20, %v626_v21  ;;  %v2553_v23 = vpop.f32.mrb[1].mxu1 }
 0x231   : > { %v629_v24 = vpop.f32.mrb[2].mxu1 }
 0x232   : > { %639 = vrot.lane.b32.xlu0 %v627_v22, %s3535_s20  ;;  %633 = vrot.lane.b32.xlu1 %v627_v22, %s3536_s23  ;;  %v2554_v25 = vpop.f32.mrb[3].mxu1  ;;  %v3105_v26 = vpack.c.bf16 %v627_v22, %v627_v22  ;;  %s3553_s23 = smov 120   ;;  %s3556_s20 = smov 64  }
 0x236   : > { %636 = vrot.lane.b32.xlu1 %v627_v22, %s3537_s30  ;;  %s3554_s30 = smov 104  }
 0x23a   : > { %653 = vrot.lane.b32.xlu1 %v3105_v26, %s3530_s26 }
 0x2a4   : > { %v634_v27 = vpop.permute.xlu1 %633  ;;  %v640_v31 = vpop.permute.xlu0 %639 }
 0x2a5   : > { %v3109_v28 = vpack.c.bf16 %v634_v27, %v634_v27  ;;  %v3117_v33 = vpack.c.bf16 %v640_v31, %v640_v31 }
 0x2a7   : > { %703 = vrot.lane.b32.xlu1 %v3109_v28, %s3530_s26 }
 0x2a8   : > { %v637_v29 = vpop.permute.xlu1 %636 }
 0x2a9   : > { %v3113_v30 = vpack.c.bf16 %v637_v29, %v637_v29 }
 0x2ab   : > { %752 = vrot.lane.b32.xlu1 %v3113_v30, %s3530_s26 }
 0x2ac   : > { %v654_v32 = vpop.permute.xlu1 %653 }
 0x2ad   : > { %v660_v34 = vsel %vm655_vm2, %v654_v32, 0 }
 0x2ae   : > { %2556 = vmatpush3.bf16.xpose.msra.mxu1 %v660_v34 }
 0x2af   : > { %801 = vrot.lane.b32.xlu1 %v3117_v33, %s3530_s26  ;;  %2561 = vmatprep.subr.bf16.mxu1 %v2918_v8  ;;  %s3534_s26 = smov 8  }
 0x2b5   : > { %2558 = vmatmul.mubr.msk.bf16.vlgmr.msra.gmra.mrb[4].mxu1 %vm655_vm2, %v3105_v26 }
 0x2b6   : > { %2563 = vmatprep.mubr.msk.bf16.mxu1 %vm2919_vm1, %v2918_v8 }
 0x319   : > { %v704_v35 = vpop.permute.xlu1 %703 }
 0x31a   : > { %v709_v36 = vsel %vm655_vm2, %v704_v35, 0 }
 0x31b   : > { %2562 = vmatpush3.bf16.xpose.msra.mxu1 %v709_v36 }
 0x31c   : > { %2567 = vmatprep.subr.bf16.mxu1 %v2918_v8 }
 0x31d   : > { %v753_v37 = vpop.permute.xlu1 %752 }
 0x31e   : > { %v758_v39 = vsel %vm655_vm2, %v753_v37, 0 }
 0x321   : > { %v802_v38 = vpop.permute.xlu1 %801 }
 0x322   : > { %2564 = vmatmul.mubr.msk.bf16.vlgmr.msra.gmra.mrb[8].mxu1 %vm655_vm2, %v3109_v28  ;;  %v807_v40 = vsel %vm655_vm2, %v802_v38, 0 }
 0x323   : > { %2568 = vmatpush3.bf16.xpose.msra.mxu1 %v758_v39  ;;  %2574 = vmatpush3.bf16.xpose.msra.mxu0 %v807_v40 }
 0x324   : > { %2569 = vmatprep.mubr.msk.bf16.mxu1 %vm2919_vm1, %v2918_v8  ;;  %2579 = vmatprep.subr.bf16.mxu1 %v2918_v8 }
 0x325   : > { %2585 = vmatprep.subr.bf16.mxu0 %v2918_v8 }
 0x32a   : > { %2570 = vmatmul.mubr.msk.bf16.vlgmr.msra.gmra.mrb[12].mxu1 %vm655_vm2, %v3113_v30  ;;  %2576 = vmatmul.mubr.msk.bf16.vlgmr.msra.gmra.mrb[0].mxu0 %vm655_vm2, %v3117_v33 }
 0x32b   : > { %2581 = vmatprep.mubr.msk.bf16.mxu1 %vm2919_vm1, %v2918_v8  ;;  %2587 = vmatprep.mubr.msk.bf16.mxu0 %vm2919_vm1, %v2918_v8 }
 0x388   : > { %v696_v42 = vpop.f32.mrb[4].mxu1 }
 0x389   : > { %v697_v43 = vadd.f32 %v3149_v41, %v696_v42  ;;  %v2559_v44 = vpop.f32.mrb[5].mxu1 }
 0x38a   : > { %v699_v45 = vpop.f32.mrb[6].mxu1 }
 0x38b   : > { %v2560_v46 = vpop.f32.mrb[7].mxu1  ;;  %v849_v47 = vsel %vm655_vm2, %v697_v43, -inf }
 0x38c   : > { %850 = vmax.xlane.f32.xlu1 %v849_v47 }
 0x3f5   : > { %v745_v48 = vpop.f32.mrb[8].mxu1 }
 0x3f6   : > { %v746_v49 = vadd.f32 %v3149_v41, %v745_v48  ;;  %v2565_v50 = vpop.f32.mrb[9].mxu1 }
 0x3f7   : > { %v748_v51 = vpop.f32.mrb[10].mxu1 }
 0x3f8   : > { %v2566_v52 = vpop.f32.mrb[11].mxu1  ;;  %v852_v53 = vsel %vm655_vm2, %v746_v49, -inf }
 0x3f9   : > { %853 = vmax.xlane.f32.xlu0 %v852_v53  ;;  %v2782_v53 = vld [vmem:[%s3516_s6] sm:$0xff]  }
 0x3fd   : > { %v794_v54 = vpop.f32.mrb[12].mxu1  ;;  %v843_v55 = vpop.f32.mrb[0].mxu0 }
 0x3fe   : > { %v795_v56 = vadd.f32 %v3149_v41, %v794_v54  ;;  %v844_v57 = vadd.f32 %v3149_v41, %v843_v55  ;;  %v2571_v58 = vpop.f32.mrb[13].mxu1  ;;  %v2577_v59 = vpop.f32.mrb[1].mxu0  ;;  %v2783_v54 = vld [vmem:[%s3516_s6 + $0x8] sm:$0xff]  }
 0x3ff   : > { %v797_v60 = vpop.f32.mrb[14].mxu1  ;;  %v846_v61 = vpop.f32.mrb[2].mxu0 }
 0x400   : > { %v2572_v62 = vpop.f32.mrb[15].mxu1  ;;  %v2578_v63 = vpop.f32.mrb[3].mxu0  ;;  %v858_v0 = vsel %vm655_vm2, %v844_v57, -inf  ;;  %v855_v1 = vsel %vm655_vm2, %v795_v56, -inf }
 0x401   : > { %859 = vmax.xlane.f32.xlu0 %v858_v0  ;;  %856 = vmax.xlane.f32.xlu1 %v855_v1 }
 0x412   : > { %897 = vrot.lane.b32.xlu1 %v3105_v26, %s3528_s18 }
 0x419   : > { %v851_v2 = vpop.xlane.xlu1 %850 }
 0x41a   : > { %v861_v3 = vsub.f32 %v697_v43, %v851_v2 }
 0x41c   : > { %v865_v4 = vmul.f32 1.442695, %v861_v3 }
 0x41e   : > { %2810 = vpow2.f32 %v865_v4 }
 0x428   : > { %v2811_v5 = vpop.eup %2810 }
 0x429   : > { %v873_v6 = vsel %vm655_vm2, %v2811_v5, 0.0 }
 0x436   : > { %874 = vadd.xlane.f32.xlu1 %v873_v6 }
 0x447   : > { %994 = vrot.lane.b32.xlu1 %v3113_v30, %s3528_s18 }
 0x486   : > { %v854_v7 = vpop.xlane.xlu0 %853 }
 0x487   : > { %v862_v9 = vsub.f32 %v746_v49, %v854_v7 }
 0x489   : > { %v867_v10 = vmul.f32 1.442695, %v862_v9 }
 0x48b   : > { %2812 = vpow2.f32 %v867_v10 }
 0x48e   : > { %v860_v11 = vpop.xlane.xlu0 %859  ;;  %v857_v12 = vpop.xlane.xlu1 %856 }
 0x48f   : > { %v864_v13 = vsub.f32 %v844_v57, %v860_v11  ;;  %v863_v14 = vsub.f32 %v795_v56, %v857_v12  ;;  %v2385_v11 = vld [vmem:[%s3517_s7] ss:$0 sm:$0xff] }
 0x491   : > { %v871_v15 = vmul.f32 1.442695, %v864_v13  ;;  %v869_v16 = vmul.f32 1.442695, %v863_v14 }
 0x492   : > { %v898_v17 = vpop.permute.xlu1 %897 }
 0x493   : > { %2814 = vpow2.f32 %v871_v15  ;;  %v904_v19 = vsel %vm902_vm3, %v898_v17, 0 }
 0x494   : > { %2816 = vpow2.f32 %v869_v16  ;;  %2580 = vmatpush3.bf16.msra.mxu1 %v904_v19 }
 0x495   : > { %v2813_v20 = vpop.eup %2812  ;;  %2591 = vmatprep.subr.bf16.mxu1 %v2918_v8 }
 0x496   : > { %v876_v21 = vsel %vm655_vm2, %v2813_v20, 0.0 }
 0x497   : > { %877 = vadd.xlane.f32.xlu0 %v876_v21 }
 0x49d   : > { %v2815_v22 = vpop.eup %2814 }
 0x49e   : > { %v2817_v23 = vpop.eup %2816  ;;  %v882_v24 = vsel %vm655_vm2, %v2815_v22, 0.0 }
 0x49f   : > { %883 = vadd.xlane.f32.xlu0 %v882_v24  ;;  %v879_v25 = vsel %vm655_vm2, %v2817_v23, 0.0 }
 0x4a0   : > { %880 = vadd.xlane.f32.xlu1 %v879_v25  ;;  %v2784_v25 = vld [vmem:[%s3520_s10] sm:$0xff]  }
 0x4b1   : > { %1042 = vrot.lane.b32.xlu1 %v3117_v33, %s3528_s18 }
 0x4b5   : > { %946 = vrot.lane.b32.xlu0 %v3109_v28, %s3528_s18 }
 0x4c3   : > { %v875_v26 = vpop.xlane.xlu1 %874 }
 0x4c4   : > { %2818 = vrcp.f32 %v875_v26  ;;  %v2786_v26 = vld [vmem:[%s3522_s12] sm:$0xff]  }
 0x4c7   : > { %v995_v30 = vpop.permute.xlu1 %994 }
 0x4c8   : > { %v1000_v32 = vsel %vm902_vm3, %v995_v30, 0 }
 0x4ce   : > { %v2819_v27 = vpop.eup %2818 }
 0x4cf   : > { %v889_v29 = vmul.f32 %v2819_v27, %v2811_v5 }
 0x4d1   : > { %v893_v31 = vpack.c.bf16 %v889_v29, %v889_v29 }
 0x4d3   : > { %2582 = vmatmul.mubr.msk.bf16.vlgmr.msra.gmra.mrb[16].mxu1 %vm655_vm2, %v893_v31 }
 0x4d4   : > { %2592 = vmatpush3.bf16.msra.mxu1 %v1000_v32  ;;  %2593 = vmatprep.mubr.msk.bf16.mxu1 %vm2919_vm1, %v2918_v8  ;;  %v2389_v32 = vld [vmem:[%s3518_s8] ss:$0 sm:$0xff] }
 0x4d5   : > { %2603 = vmatprep.subr.bf16.mxu1 %v2918_v8 }
 0x524   : > { %v878_v33 = vpop.xlane.xlu0 %877 }
 0x525   : > { %2820 = vrcp.f32 %v878_v33 }
 0x52c   : > { %v884_v34 = vpop.xlane.xlu0 %883 }
 0x52d   : > { %2822 = vrcp.f32 %v884_v34  ;;  %v881_v28 = vpop.xlane.xlu1 %880  ;;  %v2390_v34 = vld [vmem:[%s3519_s9] ss:$0 sm:$0xff] }
 0x52e   : > { %2824 = vrcp.f32 %v881_v28 }
 0x52f   : > { %v2821_v35 = vpop.eup %2820 }
 0x530   : > { %v890_v36 = vmul.f32 %v2821_v35, %v2813_v20  ;;  %v947_v37 = vpop.permute.xlu0 %946 }
 0x531   : > { %v952_v38 = vsel %vm902_vm3, %v947_v37, 0  ;;  %v1043_v39 = vpop.permute.xlu1 %1042  ;;  %v2787_v37 = vld [vmem:[%s3522_s12 + $0x8] sm:$0xff]  }
 0x532   : > { %2586 = vmatpush3.bf16.msra.mxu0 %v952_v38  ;;  %v894_v40 = vpack.c.bf16 %v890_v36, %v890_v36  ;;  %v1048_v42 = vsel %vm902_vm3, %v1043_v39, 0  ;;  %v2788_v38 = vld [vmem:[%s3522_s12 + $0x10] sm:$0xff]   ;;  %v2789_v39 = vld [vmem:[%s3522_s12 + $0x18] sm:$0xff]  }
 0x533   : > { %2597 = vmatprep.subr.bf16.mxu0 %v2918_v8 }
 0x535   : > { %2588 = vmatmul.mubr.msk.bf16.vlgmr.msra.gmra.mrb[4].mxu0 %vm655_vm2, %v894_v40  ;;  %v2790_v40 = vld [vmem:[%s3522_s12 + $0x20] sm:$0xff]  }
 0x536   : > { %2598 = vmatpush3.bf16.msra.mxu0 %v1048_v42  ;;  %2599 = vmatprep.mubr.msk.bf16.mxu0 %vm2919_vm1, %v2918_v8  ;;  %v2791_v42 = vld [vmem:[%s3522_s12 + $0x28] sm:$0xff]  }
 0x537   : > { %v2823_v43 = vpop.eup %2822  ;;  %2611 = vmatprep.subr.bf16.mxu0 %v2918_v8 }
 0x538   : > { %v2825_v44 = vpop.eup %2824  ;;  %v892_v45 = vmul.f32 %v2823_v43, %v2815_v22  ;;  %v2792_v43 = vld [vmem:[%s3522_s12 + $0x30] sm:$0xff]  }
 0x539   : > { %v891_v46 = vmul.f32 %v2825_v44, %v2817_v23  ;;  %v2793_v44 = vld [vmem:[%s3522_s12 + $0x38] sm:$0xff]  }
 0x53a   : > { %v896_v47 = vpack.c.bf16 %v892_v45, %v892_v45  ;;  %v2391_v45 = vld [vmem:[%s3521_s11] ss:$0 sm:$0xff] }
 0x53b   : > { %v895_v48 = vpack.c.bf16 %v891_v46, %v891_v46 }
 0x53d   : > { %2594 = vmatmul.mubr.msk.bf16.vlgmr.msra.gmra.mrb[20].mxu1 %vm655_vm2, %v895_v48  ;;  %2600 = vmatmul.mubr.msk.bf16.vlgmr.msra.gmra.mrb[8].mxu0 %vm655_vm2, %v896_v47 }
 0x53e   : > { %2607 = vmatprep.mubr.msk.bf16.mxu1 %vm2919_vm1, %v2918_v8  ;;  %2615 = vmatprep.mubr.msk.bf16.mxu0 %vm2919_vm1, %v2918_v8 }
 0x53f   : > { %2604 = vmatpush3.bf16.msra.mxu1 %v2782_v53  ;;  %2612 = vmatpush3.bf16.msra.mxu0 %v2784_v25 }
 0x540   : > { %2605 = vmatprep.subr.bf16.mxu1 %v2918_v8  ;;  %2613 = vmatprep.subr.bf16.mxu0 %v2918_v8 }
 0x543   : > { %2606 = vmatpush3.bf16.msra.mxu1 %v2783_v54 }
 0x544   : > { %2619 = vmatprep.subr.bf16.mxu1 %v2918_v8 }
 0x5a6   : > { %v940_v49 = vpop.f32.mrb[16].mxu1 }
 0x5a7   : > { %v2583_v50 = vpop.f32.mrb[17].mxu1 }
 0x5a8   : > { %v943_v51 = vpop.f32.mrb[18].mxu1 }
 0x5a9   : > { %v2584_v52 = vpop.f32.mrb[19].mxu1 }
 0x608   : > { %v988_v55 = vpop.f32.mrb[4].mxu0 }
 0x609   : > { %1091 = vrot.lane.b32.xlu0 %v988_v55, %s3534_s26  ;;  %v2589_v56 = vpop.f32.mrb[5].mxu0 }
 0x60a   : > { %v991_v57 = vpop.f32.mrb[6].mxu0 }
 0x60b   : > { %v2590_v58 = vpop.f32.mrb[7].mxu0 }
 0x610   : > { %v1036_v59 = vpop.f32.mrb[20].mxu1  ;;  %v1084_v60 = vpop.f32.mrb[8].mxu0 }
 0x611   : > { %1095 = vrot.lane.b32.xlu1 %v1036_v59, %s3533_s28  ;;  %v2595_v61 = vpop.f32.mrb[21].mxu1  ;;  %1099 = vrot.lane.b32.xlu0 %v1084_v60, %s3532_s29  ;;  %v2601_v62 = vpop.f32.mrb[9].mxu0  ;;  %s3552_s28 = smov 112  }
 0x612   : > { %v1039_v63 = vpop.f32.mrb[22].mxu1  ;;  %v1087_v0 = vpop.f32.mrb[10].mxu0  ;;  %v2395_v61 = vld [vmem:[%s3523_s13] ss:$0 sm:$0xff] }
 0x613   : > { %v2596_v1 = vpop.f32.mrb[23].mxu1  ;;  %v2602_v2 = vpop.f32.mrb[11].mxu0 }
 0x67b   : > { %v1092_v3 = vpop.permute.xlu0 %1091 }
 0x67c   : > { %v1102_v4 = vsel %vm655_vm2, %v940_v49, %v1092_v3 }
 0x683   : > { %v1096_v5 = vpop.permute.xlu1 %1095  ;;  %v1100_v6 = vpop.permute.xlu0 %1099 }
 0x684   : > { %v1104_v7 = vsel %vm1103_vm4, %v1102_v4, %v1096_v5 }
 0x685   : > { %v1106_v9 = vsel %vm1105_vm5, %v1104_v7, %v1100_v6 }
 0x686   : > { %v1107_v10 = vpack.c.bf16 %v1106_v9, %v1106_v9 }
 0x688   : > { %2608 = vmatmul.mubr.msk.bf16.vlgmr.msra.gmra.mrb[24].mxu1 %vm536_vm0, %v1107_v10 }
 0x689   : > { %2635 = vmatprep.mubr.msk.bf16.mxu1 %vm2919_vm1, %v2918_v8  ;;  %2620 = vmatpush3.bf16.msra.mxu1 %v2786_v26 }
 0x68a   : > { %2621 = vmatprep.subr.bf16.mxu1 %v2918_v8 }
 0x68d   : > { %2622 = vmatpush3.bf16.msra.mxu1 %v2787_v37 }
 0x68e   : > { %2623 = vmatprep.subr.bf16.mxu1 %v2918_v8 }
 0x691   : > { %2624 = vmatpush3.bf16.msra.mxu1 %v2788_v38 }
 0x692   : > { %2625 = vmatprep.subr.bf16.mxu1 %v2918_v8 }
 0x695   : > { %2626 = vmatpush3.bf16.msra.mxu1 %v2789_v39 }
 0x696   : > { %2627 = vmatprep.subr.bf16.mxu1 %v2918_v8 }
 0x699   : > { %2628 = vmatpush3.bf16.msra.mxu1 %v2790_v40 }
 0x69a   : > { %2629 = vmatprep.subr.bf16.mxu1 %v2918_v8 }
 0x69d   : > { %2630 = vmatpush3.bf16.msra.mxu1 %v2791_v42 }
 0x69e   : > { %2631 = vmatprep.subr.bf16.mxu1 %v2918_v8 }
 0x6a1   : > { %2632 = vmatpush3.bf16.msra.mxu1 %v2792_v43 }
 0x6a2   : > { %2633 = vmatprep.subr.bf16.mxu1 %v2918_v8 }
 0x6a5   : > { %2634 = vmatpush3.bf16.msra.mxu1 %v2793_v44 }
 0x6a6   : > { %2665 = vmatprep.subr.bf16.mxu1 %v2918_v8 }
 0x75b   : > { %v1168_v12 = vpop.f32.mrb[24].mxu1 }
 0x75c   : > { %v1169_v13 = vadd.f32 %v2385_v11, %v1168_v12  ;;  %v2609_v14 = vpop.f32.mrb[25].mxu1  ;;  %v2794_v11 = vld [vmem:[%s3548_s4 + $0x10] sm:$0xff]   ;;  %v2795_v12 = vld [vmem:[%s3548_s4 + $0x18] sm:$0xff]  }
 0x75d   : > { %v1171_v15 = vpop.f32.mrb[26].mxu1 }
 0x75e   : > { %v2610_v16 = vpop.f32.mrb[27].mxu1  ;;  %v1174_v17 = vadd.f32 %v1169_v13, %v3092_v18  ;;  %v2785_v18 = vld [vmem:[%s3520_s10 + $0x8] sm:$0xff]  }
 0x75f   : > { %2614 = vmatpush3.bf16.msra.mxu0 %v2785_v18 }
 0x760   : > { %v1177_v19 = vsel %vm536_vm0, %v1174_v17, 0.0  ;;  %2639 = vmatprep.subr.bf16.mxu0 %v2918_v8 }
 0x761   : > { %1178 = vadd.xlane.f32.xlu1 %v1177_v19 }
 0x7ee   : > { %v1179_v20 = vpop.xlane.xlu1 %1178 }
 0x7ef   : > { %v1180_v21 = vmul.f32 0.03125, %v1179_v20  ;;  %v2405_v20 = vld [vmem:[%s3525_s15] ss:$0 sm:$0xff] }
 0x7f1   : > { %v1181_v22 = vsub.f32 %v1174_v17, %v1180_v21  ;;  %v2404_v17 = vld [vmem:[%s3524_s14] ss:$0 sm:$0xff] }
 0x7f3   : > { %v1182_v23 = vmul.f32 %v1181_v22, %v1181_v22 }
 0x7f5   : > { %v1183_v24 = vsel %vm536_vm0, %v1182_v23, 0.0 }
 0x7f6   : > { %1184 = vadd.xlane.f32.xlu0 %v1183_v24  ;;  %v2411_v24 = vld [vmem:[%s3515_s5 + $0x1] ss:$0 sm:$0xff] }
 0x883   : > { %v1185_v27 = vpop.xlane.xlu0 %1184 }
 0x884   : > { %v1186_v29 = vmul.f32 0.03125, %v1185_v27 }
 0x886   : > { %v1187_v30 = vadd.f32 1e-12, %v1186_v29 }
 0x888   : > { %2826 = vrsqrt.f32 %v1187_v30 }
 0x892   : > { %v2827_v31 = vpop.eup %2826 }
 0x893   : > { %v1189_v33 = vmul.f32 %v2827_v31, %v1181_v22 }
 0x895   : > { %v1196_v28 = vmul.f32 %v2389_v32, %v1189_v33 }
 0x897   : > { %v1203_v35 = vadd.f32 %v2390_v34, %v1196_v28 }
 0x899   : > { %v1204_v36 = vpack.c.bf16 %v1203_v35, %v1203_v35 }
 0x89b   : > { %2616 = vmatmul.mubr.msk.bf16.vlgmr.msra.gmra.mrb[12].mxu0 %vm536_vm0, %v1204_v36 }
 0x89c   : > { %2643 = vmatprep.mubr.msk.bf16.mxu0 %vm2919_vm1, %v2918_v8  ;;  %2640 = vmatpush3.bf16.msra.mxu0 %v2794_v11 }
 0x89d   : > { %2641 = vmatprep.subr.bf16.mxu0 %v2918_v8 }
 0x8a0   : > { %2642 = vmatpush3.bf16.msra.mxu0 %v2795_v12 }
 0x8a1   : > { %2647 = vmatprep.subr.bf16.mxu0 %v2918_v8 }
 0x96e   : > { %v1265_v46 = vpop.f32.mrb[12].mxu0 }
 0x96f   : > { %v1266_v47 = vadd.f32 %v2391_v45, %v1265_v46  ;;  %v2617_v48 = vpop.f32.mrb[13].mxu0 }
 0x970   : > { %v1268_v49 = vpop.f32.mrb[14].mxu0 }
 0x971   : > { %v1272_v50 = vmul.f32 0.044715, %v1266_v47  ;;  %v2618_v51 = vpop.f32.mrb[15].mxu0  ;;  %v1271_v57 = vmul.f32 0.5, %v1266_v47 }
 0x973   : > { %v1273_v52 = vmul.f32 %v1272_v50, %v1266_v47 }
 0x975   : > { %v1274_v53 = vmul.f32 %v1273_v52, %v1266_v47 }
 0x977   : > { %v1275_v54 = vadd.f32 %v1274_v53, %v1266_v47 }
 0x979   : > { %v1276_v55 = vmul.f32 0.7978846, %v1275_v54 }
 0x97b   : > { %2828 = vtanh.f32 %v1276_v55 }
 0x985   : > { %v2829_v56 = vpop.eup %2828 }
 0x986   : > { %v1278_v58 = vadd.f32 1.0, %v2829_v56 }
 0x988   : > { %v1279_v59 = vmul.f32 %v1278_v58, %v1271_v57 }
 0x98a   : > { %v1280_v60 = vpack.c.bf16 %v1279_v59, %v1279_v59 }
 0x98c   : > { %2636 = vmatmul.mubr.bf16.vlgmr.msra.gmra.mrb[28].mxu1 %v1280_v60 }
 0x98d   : > { %2667 = vmatprep.mubr.msk.bf16.mxu1 %vm2919_vm1, %v2918_v8 }
 0xa5f   : > { %v1386_v62 = vpop.f32.mrb[28].mxu1 }
 0xa60   : > { %v1387_v63 = vadd.f32 %v2395_v61, %v1386_v62  ;;  %v2637_v0 = vpop.f32.mrb[29].mxu1 }
 0xa61   : > { %v1389_v1 = vpop.f32.mrb[30].mxu1 }
 0xa62   : > { %v2638_v2 = vpop.f32.mrb[31].mxu1  ;;  %v1392_v3 = vadd.f32 %v1387_v63, %v1203_v35 }
 0xa64   : > { %v1395_v4 = vsel %vm536_vm0, %v1392_v3, 0.0 }
 0xa65   : > { %1396 = vadd.xlane.f32.xlu0 %v1395_v4 }
 0xaf2   : > { %v1397_v5 = vpop.xlane.xlu0 %1396 }
 0xaf3   : > { %v1398_v6 = vmul.f32 0.03125, %v1397_v5 }
 0xaf5   : > { %v1399_v7 = vsub.f32 %v1392_v3, %v1398_v6 }
 0xaf7   : > { %v1400_v9 = vmul.f32 %v1399_v7, %v1399_v7 }
 0xaf9   : > { %v1401_v10 = vsel %vm536_vm0, %v1400_v9, 0.0 }
 0xafa   : > { %1402 = vadd.xlane.f32.xlu1 %v1401_v10 }
 0xb87   : > { %v1403_v13 = vpop.xlane.xlu1 %1402 }
 0xb88   : > { %v1404_v14 = vmul.f32 0.03125, %v1403_v13 }
 0xb8a   : > { %v1405_v15 = vadd.f32 1e-12, %v1404_v14 }
 0xb8c   : > { %2830 = vrsqrt.f32 %v1405_v15 }
 0xb96   : > { %v2831_v16 = vpop.eup %2830 }
 0xb97   : > { %v1407_v19 = vmul.f32 %v2831_v16, %v1399_v7 }
 0xb99   : > { %v1414_v21 = vmul.f32 %v2404_v17, %v1407_v19 }
 0xb9b   : > { %v3287_v22 = vadd.f32 %v2405_v20, %v1414_v21 }
 0xb9d   : > { %v1422_v23 = vpack.c.bf16 %v3287_v22, %v3287_v22 }
 0xb9f   : > { %2644 = vmatmul.mubr.msk.bf16.vlgmr.msra.gmra.mrb[16].mxu0 %vm536_vm0, %v1422_v23 }
 0xba0   : > { %2649 = vmatprep.mubr.msk.bf16.mxu0 %vm2919_vm1, %v2918_v8 }
 0xc72   : > { %v1485_v25 = vpop.f32.mrb[16].mxu0 }
 0xc73   : > { %v1486_v18 = vadd.f32 %v2411_v24, %v1485_v25  ;;  %v2645_v26 = vpop.f32.mrb[17].mxu0 }
 0xc74   : > { %v1488_v27 = vpop.f32.mrb[18].mxu0 }
 0xc75   : > { %1495 = vrot.lane.b32.xlu1 %v1486_v18, %s3552_s28  ;;  %1492 = vrot.lane.b32.xlu0 %v1486_v18, %s3553_s23  ;;  %v2646_v29 = vpop.f32.mrb[19].mxu0  ;;  %v3299_v30 = vpack.c.bf16 %v1486_v18, %v1486_v18  ;;  %s3557_s23 = smov 8   ;;  %s2476_s28 = sshll.u32 %s3035_s25, 7 }
 0xc76   : > { %s3467_s4 = scalar_lea.hbm %s3526_s16, %s2476_s28  ;;  %s2928_s25 = smov [#allocation2]  }
 0xc79   : > { %1498 = vrot.lane.b32.xlu1 %v1486_v18, %s3554_s30  ;;  %1506 = vrot.lane.b32.xlu0 %v3299_v30, %s3555_s19  ;;  %s3558_s30 = smov 16  }
 0xce7   : > { %v1496_v31 = vpop.permute.xlu1 %1495  ;;  %v1493_v32 = vpop.permute.xlu0 %1492 }
 0xce8   : > { %v3304_v33 = vpack.c.bf16 %v1496_v31, %v1496_v31  ;;  %v3306_v34 = vpack.c.bf16 %v1493_v32, %v1493_v32 }
 0xcea   : > { %1555 = vrot.lane.b32.xlu1 %v3306_v34, %s3555_s19  ;;  %1604 = vrot.lane.b32.xlu0 %v3304_v33, %s3555_s19 }
 0xceb   : > { %v1499_v28 = vpop.permute.xlu1 %1498  ;;  %v1507_v35 = vpop.permute.xlu0 %1506 }
 0xcec   : > { %v3312_v36 = vpack.c.bf16 %v1499_v28, %v1499_v28  ;;  %v1512_v37 = vsel %vm655_vm2, %v1507_v35, 0 }
 0xced   : > { %2648 = vmatpush3.bf16.xpose.msra.mxu0 %v1512_v37 }
 0xcee   : > { %1653 = vrot.lane.b32.xlu1 %v3312_v36, %s3555_s19  ;;  %2653 = vmatprep.subr.bf16.mxu0 %v2918_v8  ;;  %s3559_s19 = smov 24  }
 0xcf4   : > { %2650 = vmatmul.mubr.msk.bf16.vlgmr.msra.gmra.mrb[20].mxu0 %vm655_vm2, %v3299_v30 }
 0xcf5   : > { %2655 = vmatprep.mubr.msk.bf16.mxu0 %vm2919_vm1, %v2918_v8 }
 0xd5c   : > { %v1556_v38 = vpop.permute.xlu1 %1555  ;;  %v1605_v43 = vpop.permute.xlu0 %1604 }
 0xd5d   : > { %v1561_v39 = vsel %vm655_vm2, %v1556_v38, 0  ;;  %v1610_v44 = vsel %vm655_vm2, %v1605_v43, 0 }
 0xd5e   : > { %2654 = vmatpush3.bf16.xpose.msra.mxu0 %v1561_v39 }
 0xd5f   : > { %2659 = vmatprep.subr.bf16.mxu0 %v2918_v8 }
 0xd60   : > { %v1654_v40 = vpop.permute.xlu1 %1653 }
 0xd61   : > { %v1659_v42 = vsel %vm655_vm2, %v1654_v40, 0 }
 0xd62   : > { %2666 = vmatpush3.bf16.xpose.msra.mxu1 %v1659_v42 }
 0xd63   : > { %2677 = vmatprep.subr.bf16.mxu1 %v2918_v8 }
 0xd65   : > { %2656 = vmatmul.mubr.msk.bf16.vlgmr.msra.gmra.mrb[24].mxu0 %vm655_vm2, %v3306_v34 }
 0xd66   : > { %2660 = vmatpush3.bf16.xpose.msra.mxu0 %v1610_v44  ;;  %2661 = vmatprep.mubr.msk.bf16.mxu0 %vm2919_vm1, %v2918_v8 }
 0xd67   : > { %2671 = vmatprep.subr.bf16.mxu0 %v2918_v8 }
 0xd69   : > { %2668 = vmatmul.mubr.msk.bf16.vlgmr.msra.gmra.mrb[32].mxu1 %vm655_vm2, %v3312_v36 }
 0xd6a   : > { %2679 = vmatprep.mubr.msk.bf16.mxu1 %vm2919_vm1, %v2918_v8 }
 0xd6d   : > { %2662 = vmatmul.mubr.msk.bf16.vlgmr.msra.gmra.mrb[28].mxu0 %vm655_vm2, %v3304_v33 }
 0xd6e   : > { %2673 = vmatprep.mubr.msk.bf16.mxu0 %vm2919_vm1, %v2918_v8 }
 0xdc7   : > { %v1548_v45 = vpop.f32.mrb[20].mxu0 }
 0xdc8   : > { %v1549_v46 = vadd.f32 %v3149_v41, %v1548_v45  ;;  %v2651_v47 = vpop.f32.mrb[21].mxu0 }
 0xdc9   : > { %v1551_v48 = vpop.f32.mrb[22].mxu0 }
 0xdca   : > { %v2652_v49 = vpop.f32.mrb[23].mxu0  ;;  %v1701_v50 = vsel %vm655_vm2, %v1549_v46, -inf }
 0xdcb   : > { %1702 = vmax.xlane.f32.xlu0 %v1701_v50 }
 0xe38   : > { %v1597_v51 = vpop.f32.mrb[24].mxu0 }
 0xe39   : > { %v1598_v52 = vadd.f32 %v3149_v41, %v1597_v51  ;;  %v2657_v53 = vpop.f32.mrb[25].mxu0 }
 0xe3a   : > { %v1600_v54 = vpop.f32.mrb[26].mxu0 }
 0xe3b   : > { %v2658_v55 = vpop.f32.mrb[27].mxu0  ;;  %v1704_v56 = vsel %vm655_vm2, %v1598_v52, -inf }
 0xe3c   : > { %1705 = vmax.xlane.f32.xlu1 %v1704_v56  ;;  %v1695_v57 = vpop.f32.mrb[32].mxu1  ;;  %v2796_v55 = vld [vmem:[%s3516_s6 + $0x10] sm:$0xff]   ;;  %v2797_v56 = vld [vmem:[%s3516_s6 + $0x18] sm:$0xff]  }
 0xe3d   : > { %v2669_v58 = vpop.f32.mrb[33].mxu1  ;;  %v1696_v1 = vadd.f32 %v3149_v41, %v1695_v57 }
 0xe3e   : > { %v1698_v59 = vpop.f32.mrb[34].mxu1 }
 0xe3f   : > { %v2670_v60 = vpop.f32.mrb[35].mxu1  ;;  %v1710_v4 = vsel %vm655_vm2, %v1696_v1, -inf }
 0xe40   : > { %v1646_v61 = vpop.f32.mrb[28].mxu0 }
 0xe41   : > { %v1647_v62 = vadd.f32 %v3149_v41, %v1646_v61  ;;  %v2663_v63 = vpop.f32.mrb[29].mxu0 }
 0xe42   : > { %v1649_v0 = vpop.f32.mrb[30].mxu0 }
 0xe43   : > { %v2664_v2 = vpop.f32.mrb[31].mxu0  ;;  %v1707_v3 = vsel %vm655_vm2, %v1647_v62, -inf }
 0xe44   : > { %1708 = vmax.xlane.f32.xlu0 %v1707_v3 }
 0xe48   : > { %1711 = vmax.xlane.f32.xlu0 %v1710_v4 }
 0xe4d   : > { %1749 = vrot.lane.b32.xlu1 %v3299_v30, %s3556_s20 }
 0xe58   : > { %v1703_v5 = vpop.xlane.xlu0 %1702 }
 0xe59   : > { %v1713_v6 = vsub.f32 %v1549_v46, %v1703_v5 }
 0xe5b   : > { %v1717_v7 = vmul.f32 1.442695, %v1713_v6 }
 0xe5d   : > { %2832 = vpow2.f32 %v1717_v7 }
 0xe67   : > { %v2833_v9 = vpop.eup %2832 }
 0xe68   : > { %v1725_v10 = vsel %vm655_vm2, %v2833_v9, 0.0 }
 0xe71   : > { %1726 = vadd.xlane.f32.xlu1 %v1725_v10 }
 0xe82   : > { %1845 = vrot.lane.b32.xlu1 %v3304_v33, %s3556_s20 }
 0xec9   : > { %v1706_v41 = vpop.xlane.xlu1 %1705 }
 0xeca   : > { %v1714_v11 = vsub.f32 %v1598_v52, %v1706_v41 }
 0xecc   : > { %v1719_v12 = vmul.f32 1.442695, %v1714_v11 }
 0xecd   : > { %v1750_v13 = vpop.permute.xlu1 %1749 }
 0xece   : > { %2834 = vpow2.f32 %v1719_v12  ;;  %v1755_v14 = vsel %vm902_vm3, %v1750_v13, 0  ;;  %v2428_v12 = vld [vmem:[%s3517_s7 + $0x1] ss:$0 sm:$0xff] }
 0xecf   : > { %2672 = vmatpush3.bf16.msra.mxu0 %v1755_v14 }
 0xed0   : > { %2683 = vmatprep.subr.bf16.mxu0 %v2918_v8 }
 0xed1   : > { %v1709_v15 = vpop.xlane.xlu0 %1708 }
 0xed2   : > { %v1715_v16 = vsub.f32 %v1647_v62, %v1709_v15 }
 0xed4   : > { %v1721_v17 = vmul.f32 1.442695, %v1715_v16 }
 0xed5   : > { %v1712_v19 = vpop.xlane.xlu0 %1711 }
 0xed6   : > { %2836 = vpow2.f32 %v1721_v17  ;;  %v1716_v20 = vsub.f32 %v1696_v1, %v1712_v19 }
 0xed8   : > { %v2835_v21 = vpop.eup %2834  ;;  %v1723_v23 = vmul.f32 1.442695, %v1716_v20 }
 0xed9   : > { %v1728_v24 = vsel %vm655_vm2, %v2835_v21, 0.0 }
 0xeda   : > { %2838 = vpow2.f32 %v1723_v23  ;;  %1729 = vadd.xlane.f32.xlu0 %v1728_v24 }
 0xee0   : > { %v2837_v25 = vpop.eup %2836 }
 0xee1   : > { %v1731_v18 = vsel %vm655_vm2, %v2837_v25, 0.0 }
 0xee2   : > { %1732 = vadd.xlane.f32.xlu1 %v1731_v18 }
 0xee4   : > { %v2839_v26 = vpop.eup %2838 }
 0xee5   : > { %v1734_v27 = vsel %vm655_vm2, %v2839_v26, 0.0 }
 0xee6   : > { %1735 = vadd.xlane.f32.xlu0 %v1734_v27  ;;  %v2799_v27 = vld [vmem:[%s3520_s10 + $0x18] sm:$0xff]  }
 0xef3   : > { %1893 = vrot.lane.b32.xlu1 %v3312_v36, %s3556_s20 }
 0xefc   : > { %1797 = vrot.lane.b32.xlu0 %v3306_v34, %s3556_s20 }
 0xefe   : > { %v1727_v29 = vpop.xlane.xlu1 %1726 }
 0xeff   : > { %2840 = vrcp.f32 %v1727_v29 }
 0xf02   : > { %v1846_v32 = vpop.permute.xlu1 %1845 }
 0xf03   : > { %v1851_v28 = vsel %vm902_vm3, %v1846_v32, 0 }
 0xf09   : > { %v2841_v30 = vpop.eup %2840 }
 0xf0a   : > { %v1741_v31 = vmul.f32 %v2841_v30, %v2833_v9 }
 0xf0c   : > { %v1745_v33 = vpack.c.bf16 %v1741_v31, %v1741_v31 }
 0xf0e   : > { %2674 = vmatmul.mubr.msk.bf16.vlgmr.msra.gmra.mrb[32].mxu0 %vm655_vm2, %v1745_v33  ;;  %v2434_v33 = vld [vmem:[%s3518_s8 + $0x1] ss:$0 sm:$0xff] }
 0xf0f   : > { %2684 = vmatpush3.bf16.msra.mxu0 %v1851_v28  ;;  %2685 = vmatprep.mubr.msk.bf16.mxu0 %vm2919_vm1, %v2918_v8 }
 0xf10   : > { %2695 = vmatprep.subr.bf16.mxu0 %v2918_v8 }
 0xf67   : > { %v1730_v35 = vpop.xlane.xlu0 %1729 }
 0xf68   : > { %2842 = vrcp.f32 %v1730_v35  ;;  %v2435_v35 = vld [vmem:[%s3519_s9 + $0x1] ss:$0 sm:$0xff] }
 0xf6f   : > { %v1733_v36 = vpop.xlane.xlu1 %1732 }
 0xf70   : > { %2844 = vrcp.f32 %v1733_v36 }
 0xf72   : > { %v2843_v34 = vpop.eup %2842 }
 0xf73   : > { %v1736_v37 = vpop.xlane.xlu0 %1735  ;;  %v1742_v38 = vmul.f32 %v2843_v34, %v2835_v21  ;;  %v1894_v42 = vpop.permute.xlu1 %1893 }
 0xf74   : > { %2846 = vrcp.f32 %v1736_v37  ;;  %v1899_v46 = vsel %vm902_vm3, %v1894_v42, 0  ;;  %v2804_v42 = vld [vmem:[%s3522_s12 + $0x60] sm:$0xff]  }
 0xf75   : > { %v1746_v44 = vpack.c.bf16 %v1742_v38, %v1742_v38  ;;  %v2801_v38 = vld [vmem:[%s3522_s12 + $0x48] sm:$0xff]  }
 0xf77   : > { %v1798_v39 = vpop.permute.xlu0 %1797 }
 0xf78   : > { %v1803_v40 = vsel %vm902_vm3, %v1798_v39, 0  ;;  %v2802_v39 = vld [vmem:[%s3522_s12 + $0x50] sm:$0xff]  }
 0xf79   : > { %2678 = vmatpush3.bf16.msra.mxu1 %v1803_v40  ;;  %v2803_v40 = vld [vmem:[%s3522_s12 + $0x58] sm:$0xff]  }
 0xf7a   : > { %v2845_v43 = vpop.eup %2844  ;;  %2689 = vmatprep.subr.bf16.mxu1 %v2918_v8 }
 0xf7b   : > { %v1743_v45 = vmul.f32 %v2845_v43, %v2837_v25  ;;  %v2805_v43 = vld [vmem:[%s3522_s12 + $0x68] sm:$0xff]  }
 0xf7c   : > { %2680 = vmatmul.mubr.msk.bf16.vlgmr.msra.gmra.mrb[36].mxu1 %vm655_vm2, %v1746_v44  ;;  %v2806_v44 = vld [vmem:[%s3522_s12 + $0x70] sm:$0xff]  }
 0xf7d   : > { %2690 = vmatpush3.bf16.msra.mxu1 %v1899_v46  ;;  %v1747_v47 = vpack.c.bf16 %v1743_v45, %v1743_v45  ;;  %2691 = vmatprep.mubr.msk.bf16.mxu1 %vm2919_vm1, %v2918_v8  ;;  %v2807_v45 = vld [vmem:[%s3522_s12 + $0x78] sm:$0xff]   ;;  %v2441_v46 = vld [vmem:[%s3521_s11 + $0x1] ss:$0 sm:$0xff] }
 0xf7e   : > { %v2847_v48 = vpop.eup %2846  ;;  %2703 = vmatprep.subr.bf16.mxu1 %v2918_v8 }
 0xf7f   : > { %v1744_v49 = vmul.f32 %v2847_v48, %v2839_v26  ;;  %2686 = vmatmul.mubr.msk.bf16.vlgmr.msra.gmra.mrb[36].mxu0 %vm655_vm2, %v1747_v47  ;;  %v2798_v26 = vld [vmem:[%s3520_s10 + $0x10] sm:$0xff]  }
 0xf80   : > { %2699 = vmatprep.mubr.msk.bf16.mxu0 %vm2919_vm1, %v2918_v8  ;;  %2696 = vmatpush3.bf16.msra.mxu0 %v2796_v55 }
 0xf81   : > { %v1748_v50 = vpack.c.bf16 %v1744_v49, %v1744_v49  ;;  %2697 = vmatprep.subr.bf16.mxu0 %v2918_v8 }
 0xf84   : > { %2692 = vmatmul.mubr.msk.bf16.vlgmr.msra.gmra.mrb[40].mxu1 %vm655_vm2, %v1748_v50  ;;  %2698 = vmatpush3.bf16.msra.mxu0 %v2797_v56 }
 0xf85   : > { %2707 = vmatprep.mubr.msk.bf16.mxu1 %vm2919_vm1, %v2918_v8  ;;  %2711 = vmatprep.subr.bf16.mxu0 %v2918_v8 }
 0xf86   : > { %2704 = vmatpush3.bf16.msra.mxu1 %v2798_v26 }
 0xf87   : > { %2705 = vmatprep.subr.bf16.mxu1 %v2918_v8 }
 0xf8a   : > { %2706 = vmatpush3.bf16.msra.mxu1 %v2799_v27 }
 0xfe1   : > { %v1791_v51 = vpop.f32.mrb[32].mxu0 }
 0xfe2   : > { %v2675_v52 = vpop.f32.mrb[33].mxu0 }
 0xfe3   : > { %v1794_v53 = vpop.f32.mrb[34].mxu0 }
 0xfe4   : > { %v2676_v54 = vpop.f32.mrb[35].mxu0 }
0x104f   : > { %v1839_v57 = vpop.f32.mrb[36].mxu1 }
0x1050   : > { %1942 = vrot.lane.b32.xlu0 %v1839_v57, %s3557_s23  ;;  %v2681_v58 = vpop.f32.mrb[37].mxu1 }
0x1051   : > { %v1842_v59 = vpop.f32.mrb[38].mxu1 }
0x1052   : > { %v2682_v60 = vpop.f32.mrb[39].mxu1  ;;  %v1887_v61 = vpop.f32.mrb[36].mxu0 }
0x1053   : > { %1946 = vrot.lane.b32.xlu1 %v1887_v61, %s3558_s30  ;;  %v2687_v62 = vpop.f32.mrb[37].mxu0  ;;  %v2462_v61 = vld [vmem:[%s3523_s13 + $0x1] ss:$0 sm:$0xff]  ;;  %s521_s30 = sand.u32 1, %s2908_s22  }
0x1054   : > { %v1890_v63 = vpop.f32.mrb[38].mxu0  ;;  %s2283_s20 = scalar_lea.sflag [#allocation3], %s521_s30 }
0x1055   : > { %v2688_v0 = vpop.f32.mrb[39].mxu0 }
0x1057   : > { %v1935_v1 = vpop.f32.mrb[40].mxu1 }
0x1058   : > { %1950 = vrot.lane.b32.xlu0 %v1935_v1, %s3559_s19  ;;  %v2693_v2 = vpop.f32.mrb[41].mxu1  ;;  %s2368_s19 = sshll.u32 %s521_s30, 3 }
0x1059   : > { %v1938_v3 = vpop.f32.mrb[42].mxu1  ;;  %s523_s23 = scalar_lea.vmem [#allocation2], %s2368_s19  ;;  %s2858_s19 = sshll.u32 %s2928_s25, 4  ;;  %s2859_s19 = int_to_ptr.vmem [resolvable:$false] %s2858_s19 }
0x105a   : > { %v2694_v4 = vpop.f32.mrb[43].mxu1  ;;  %s2296_s1 = sshll.u32 %s523_s23, 4  ;;  %s2860_s29 = scalar_lea.vmem %s2859_s19, 256  ;;  %s3469_s1 = int_to_ptr.vmem [resolvable:$true] %s2296_s1 }
0x105b   : > { %s2854_s26 = scalar_lea.vmem %s3469_s1, 128  ;;  %p2861_p0 = scmp.lt.s32.totalorder %s3469_s1, %s2859_s19 }
0x105c   : > { %p2855_p11 = scmp.ne.s32.totalorder %s3469_s1, %s2854_s26  ;;  %p2862_p1 = scmp.lt.s32.totalorder %s2860_s29, %s2854_s26 }
0x105e   : > { %p2856_p12 = pnand %p2855_p11, %p3052_p5  ;;  %p2863_p2 = por %p2862_p1, %p2861_p0 }
0x1060   : > { %p2857_p13 = pneg %p2856_p12 }
0x1062   : > { %p2864_p3 = pnand %p2863_p2, %p2857_p13 }
0x10c2   : > { %v1943_v5 = vpop.permute.xlu0 %1942 }
0x10c3   : > { %v1953_v7 = vsel %vm655_vm2, %v1791_v51, %v1943_v5 }
0x10c5   : > { %v1947_v6 = vpop.permute.xlu1 %1946 }
0x10c6   : > { %v1954_v9 = vsel %vm1103_vm4, %v1953_v7, %v1947_v6 }
0x10ca   : > { %v1951_v10 = vpop.permute.xlu0 %1950 }
0x10cb   : > { %v1955_v41 = vsel %vm1105_vm5, %v1954_v9, %v1951_v10 }
0x10cc   : > { %v1956_v11 = vpack.c.bf16 %v1955_v41, %v1955_v41 }
0x10ce   : > { %2700 = vmatmul.mubr.msk.bf16.vlgmr.msra.gmra.mrb[40].mxu0 %vm536_vm0, %v1956_v11 }
0x10cf   : > { %2727 = vmatprep.mubr.msk.bf16.mxu0 %vm2919_vm1, %v2918_v8 }
0x11a1   : > { %v2019_v13 = vpop.f32.mrb[40].mxu0 }
0x11a2   : > { %v2020_v14 = vadd.f32 %v2428_v12, %v2019_v13  ;;  %v2701_v15 = vpop.f32.mrb[41].mxu0 }
0x11a3   : > { %v2022_v16 = vpop.f32.mrb[42].mxu0 }
0x11a4   : > { %v2702_v17 = vpop.f32.mrb[43].mxu0  ;;  %v2025_v19 = vadd.f32 %v2020_v14, %v3287_v22  ;;  %v2800_v22 = vld [vmem:[%s3522_s12 + $0x40] sm:$0xff]  }
0x11a5   : > { %2712 = vmatpush3.bf16.msra.mxu0 %v2800_v22  ;;  %v2473_v14 = vld [vmem:[%s3524_s14 + $0x1] ss:$0 sm:$0xff] }
0x11a6   : > { %v2030_v20 = vsel %vm536_vm0, %v2025_v19, 0.0  ;;  %2713 = vmatprep.subr.bf16.mxu0 %v2918_v8  ;;  %v2474_v16 = vld [vmem:[%s3525_s15 + $0x1] ss:$0 sm:$0xff] }
0x11a7   : > { %2031 = vadd.xlane.f32.xlu1 %v2030_v20 }
0x11a9   : > { %2714 = vmatpush3.bf16.msra.mxu0 %v2801_v38 }
0x11aa   : > { %2715 = vmatprep.subr.bf16.mxu0 %v2918_v8 }
0x11ad   : > { %2716 = vmatpush3.bf16.msra.mxu0 %v2802_v39 }
0x11ae   : > { %2717 = vmatprep.subr.bf16.mxu0 %v2918_v8 }
0x11b1   : > { %2718 = vmatpush3.bf16.msra.mxu0 %v2803_v40 }
0x11b2   : > { %2719 = vmatprep.subr.bf16.mxu0 %v2918_v8 }
0x11b5   : > { %2720 = vmatpush3.bf16.msra.mxu0 %v2804_v42 }
0x11b6   : > { %2721 = vmatprep.subr.bf16.mxu0 %v2918_v8 }
0x11b9   : > { %2722 = vmatpush3.bf16.msra.mxu0 %v2805_v43 }
0x11ba   : > { %2723 = vmatprep.subr.bf16.mxu0 %v2918_v8 }
0x11bd   : > { %2724 = vmatpush3.bf16.msra.mxu0 %v2806_v44 }
0x11be   : > { %2725 = vmatprep.subr.bf16.mxu0 %v2918_v8 }
0x11c1   : > { %2726 = vmatpush3.bf16.msra.mxu0 %v2807_v45 }
0x1234   : > { %v2032_v21 = vpop.xlane.xlu1 %2031 }
0x1235   : > { %v2033_v23 = vmul.f32 0.03125, %v2032_v21 }
0x1237   : > { %v2034_v24 = vsub.f32 %v2025_v19, %v2033_v23 }
0x1239   : > { %v2035_v25 = vmul.f32 %v2034_v24, %v2034_v24 }
0x123b   : > { %v2036_v18 = vsel %vm536_vm0, %v2035_v25, 0.0 }
0x123c   : > { %2037 = vadd.xlane.f32.xlu0 %v2036_v18 }
0x12c9   : > { %v2038_v29 = vpop.xlane.xlu0 %2037 }
0x12ca   : > { %v2039_v30 = vmul.f32 0.03125, %v2038_v29 }
0x12cc   : > { %v2040_v31 = vadd.f32 1e-12, %v2039_v30 }
0x12ce   : > { %2848 = vrsqrt.f32 %v2040_v31 }
0x12d8   : > { %v2849_v32 = vpop.eup %2848 }
0x12d9   : > { %v2042_v28 = vmul.f32 %v2849_v32, %v2034_v24 }
0x12db   : > { %v2049_v36 = vmul.f32 %v2434_v33, %v2042_v28 }
0x12dd   : > { %v2056_v34 = vadd.f32 %v2435_v35, %v2049_v36 }
0x12df   : > { %v2057_v37 = vpack.c.bf16 %v2056_v34, %v2056_v34 }
0x12e1   : > { %2708 = vmatmul.mubr.msk.bf16.vlgmr.msra.gmra.mrb[44].mxu1 %vm536_vm0, %v2057_v37 }
0x13b4   : > { %v2120_v47 = vpop.f32.mrb[44].mxu1 }
0x13b5   : > { %v2121_v48 = vadd.f32 %v2441_v46, %v2120_v47  ;;  %v2709_v49 = vpop.f32.mrb[45].mxu1 }
0x13b6   : > { %v2123_v50 = vpop.f32.mrb[46].mxu1 }
0x13b7   : > { %v2127_v51 = vmul.f32 0.044715, %v2121_v48  ;;  %v2710_v52 = vpop.f32.mrb[47].mxu1  ;;  %v2126_v58 = vmul.f32 0.5, %v2121_v48 }
0x13b9   : > { %v2128_v53 = vmul.f32 %v2127_v51, %v2121_v48 }
0x13bb   : > { %v2129_v54 = vmul.f32 %v2128_v53, %v2121_v48 }
0x13bd   : > { %v2130_v55 = vadd.f32 %v2129_v54, %v2121_v48 }
0x13bf   : > { %v2131_v56 = vmul.f32 0.7978846, %v2130_v55 }
0x13c1   : > { %2850 = vtanh.f32 %v2131_v56 }
0x13cb   : > { %v2851_v57 = vpop.eup %2850 }
0x13cc   : > { %v2133_v59 = vadd.f32 1.0, %v2851_v57 }
0x13ce   : > { %v2134_v8 = vmul.f32 %v2133_v59, %v2126_v58 }
0x13d0   : > { %v2135_v60 = vpack.c.bf16 %v2134_v8, %v2134_v8 }
0x13d2   : > { %2728 = vmatmul.mubr.bf16.vlgmr.msra.gmra.mrb[44].mxu0 %v2135_v60 }
0x14a5   : > { %v2243_v62 = vpop.f32.mrb[44].mxu0 }
0x14a6   : > { %v2244_v63 = vadd.f32 %v2462_v61, %v2243_v62  ;;  %v2729_v0 = vpop.f32.mrb[45].mxu0 }
0x14a7   : > { %v2246_v1 = vpop.f32.mrb[46].mxu0 }
0x14a8   : > { %v2730_v2 = vpop.f32.mrb[47].mxu0  ;;  %v2249_v3 = vadd.f32 %v2244_v63, %v2056_v34 }
0x14aa   : > { %v2254_v4 = vsel %vm536_vm0, %v2249_v3, 0.0 }
0x14ab   : > { %2255 = vadd.xlane.f32.xlu0 %v2254_v4 }
0x1538   : > { %v2256_v5 = vpop.xlane.xlu0 %2255 }
0x1539   : > { %v2257_v6 = vmul.f32 0.03125, %v2256_v5 }
0x153b   : > { %v2258_v7 = vsub.f32 %v2249_v3, %v2257_v6 }
0x153d   : > { %v2259_v9 = vmul.f32 %v2258_v7, %v2258_v7 }
0x153f   : > { %v2260_v10 = vsel %vm536_vm0, %v2259_v9, 0.0 }
0x1540   : > { %2261 = vadd.xlane.f32.xlu1 %v2260_v10 }
0x15cd   : > { %v2262_v41 = vpop.xlane.xlu1 %2261 }
0x15ce   : > { %v2263_v11 = vmul.f32 0.03125, %v2262_v41 }
0x15d0   : > { %v2264_v12 = vadd.f32 1e-12, %v2263_v11 }
0x15d2   : > { %2852 = vrsqrt.f32 %v2264_v12 }
0x15dc   : > { %v2853_v13 = vpop.eup %2852 }
0x15dd   : > { %v2266_v15 = vmul.f32 %v2853_v13, %v2258_v7 }
0x15df   : > { %v2273_v17 = vmul.f32 %v2473_v14, %v2266_v15 }
0x15e1   : > { %v2280_v19 = vadd.f32 %v2474_v16, %v2273_v17 }
0x15e3   : > { %2281 = vst.msk [vmem:[%s523_s23] sm:$0xff] %vm536_vm0, %v2280_v19 }
0x15e4   : > { %2867 = shalt.err (!%p2864_p3)
}
0x15e5   : > { %s2868_s2 = scalar_lea.hbm %s3467_s4, 128  ;;  %s2872_s18 = scalar_lea.hbm %s3526_s16, 256 }
0x15e6   : > { %p2869_p4 = scmp.ne.s32.totalorder %s3467_s4, %s2868_s2  ;;  %p2873_p9 = scmp.lt.u32.totalorder %s3467_s4, %s3526_s16 }
0x15e7   : > { %p2874_p10 = scmp.lt.u32.totalorder %s2872_s18, %s2868_s2  ;;  %p2876_p12 = scmp.lt.u32.totalorder %s2868_s2, %s3467_s4 }
0x15e8   : > { %p2870_p7 = pnand %p2869_p4, %p3052_p5 }
0x15e9   : > { %p2875_p11 = por %p2874_p10, %p2873_p9 }
0x15ea   : > { %p2871_p8 = pneg %p2870_p7 }
0x15eb   : > { %p2877_p13 = por %p2876_p12, %p2875_p11 }
0x15ed   : > { %p2878_p0 = pnand %p2877_p13, %p2871_p8 }
0x15ef   : > { %2881 = shalt.err (!%p2878_p0)
}
0x15f0   : > { %2731 = dma.vmem_to_hbm [thread:$0]  (%p3052_p5), %s3469_s1, 128, %s3467_s4, %s2283_s20  }
0x15f1 PF: > { %p2737_p1 = scmp.ge.s32.totalorder %s2916_s24, 2  ;;  %s2308_s26 = sand.u32 1, %s2904_s21  }
0x15f2   : > { %s2309_s25 = scalar_lea.sflag [#allocation3], %s2308_s26 }
0x15f3   : > { %p2734_p2 = pnand %p2737_p1, %p3056_p6 }
0x15f5   : > { %2899 = dma.done.wait (!%p2734_p2), %s2309_s25, 128  }
0x15f6   : > { %2901 = vsyncadd (!%p2734_p2), %s2309_s25, 4294967168  ;;  %s3560_s19 = sld [smem:[#allocation5_spill]]  ;;  %s3561_s23 = sld [smem:[#allocation6_spill]] }
0x15f7   : > { %p26_p3 = scmp.ge.s32.totalorder %s3039_s27, 4   ;;  %s3562_s21 = smov %s2908_s22 }
0x15f8   : > { %s3564_s24 = smov %s3039_s27 }
0x15f9   :  { %28 = sbr.rel (!%p26_p3) target bundleno = 9 (0x9), region = 134 }
0x15fc   : > { %s3563_s22 = smov %s3560_s19 }
0x1600   :  { %2314 = vsyncpa [#allocation3], 1 }
0x1601   :  { %2316 = vsyncpa [#allocation3 + $0x1], 1 }

</bundles_post_ra>
